<compile_context>
chip_gen: v7x
topology: tpu7x:2x2x1
jax: 0.10.0
libtpu: 0.0.40
codegen_flags: <defaults>
</compile_context>

<pallas_src>
import functools

import jax
import jax.numpy as jnp
from jax.experimental import pallas as pl
from jax.experimental.pallas import tpu as pltpu


# ----------------------------------------------------------------------------
# Fused kernel builder: multi-layer GRU + Linear + Sigmoid, grid-less,
# statically unrolled over time.
# ----------------------------------------------------------------------------
def _make_generator_kernel(T, B, F, H, num_layers):
    f32 = jnp.float32
    H2, H3, H4 = 2 * H, 3 * H, 4 * H

    def kernel(x_ref, w_ix0_ref, w_h0_ref, *rest):
        if num_layers > 1:
            w_big_ref = rest[0]
            biases_ref, w_lin_ref, out_ref = rest[1], rest[2], rest[3]
        else:
            w_big_ref = None
            biases_ref, w_lin_ref, out_ref = rest[0], rest[1], rest[2]

        # ---- Hoisted layer-0 input projection (off the serial chain). ------
        # gx0_all rows are time-major: row t*B + b.
        bx0 = biases_ref[0:1, :]                                   # (1, 4H)
        gx0_all = jnp.dot(x_ref[...], w_ix0_ref[...],
                          preferred_element_type=f32) + bx0        # (T*B, 4H)

        # ---- Per-layer fused weights/biases.  After gate fusion this is only
        #      4 vregs (layer 0) + 8 vregs per upper layer, so holding them
        #      live across the unrolled loop fits the vreg file comfortably.
        w_h0 = w_h0_ref[...]                                       # (H, 4H)
        bh0 = biases_ref[1:2, :]                                   # [0|0|0|b_hn0]
        upper = []
        for l in range(1, num_layers):
            upper.append((w_big_ref[l - 1],                        # (2H, 4H)
                          biases_ref[l + 1:l + 2, :]))             # (1, 4H)

        def gates(g, h_prev):
            # g = [r_pre | z_pre | n_x | n_h]   (B, 4H)
            rz = jax.nn.sigmoid(g[:, :H2])        # one EUP push for r and z
            r = rz[:, :H]
            z = rz[:, H:H2]
            n = jnp.tanh(g[:, H2:H3] + r * g[:, H3:H4])
            return (1.0 - z) * n + z * h_prev

        hs = [jnp.zeros((B, H), f32) for _ in range(num_layers)]
        top = []

        # ---- Statically unrolled time loop (T is tiny). ---------------------
        for t in range(T):
            lo = t * B
            # layer 0: ONE (B,H)x(H,4H) matmul on the recurrence chain.
            g0 = (gx0_all[lo:lo + B]
                  + jnp.dot(hs[0], w_h0, preferred_element_type=f32)
                  + bh0)
            hs[0] = gates(g0, hs[0])
            # layers l>0: ONE (B,2H)x(2H,4H) matmul fuses the same-step input
            # projection with the hidden projection.
            for l in range(1, num_layers):
                w_big_l, b_big_l = upper[l - 1]
                cat = jnp.concatenate([hs[l - 1], hs[l]], axis=1)   # (B, 2H)
                g = jnp.dot(cat, w_big_l, preferred_element_type=f32) + b_big_l
                hs[l] = gates(g, hs[l])
            top.append(hs[-1])

        # ---- Head hoisted out of the loop: one matmul, one sigmoid, one
        #      contiguous (T*B, H) store. --------------------------------------
        seq = jnp.concatenate(top, axis=0)                          # (T*B, H)
        b_lin = biases_ref[num_layers + 1:num_layers + 2, :H]       # (1, H)
        out = jax.nn.sigmoid(
            jnp.dot(seq, w_lin_ref[...], preferred_element_type=f32) + b_lin)
        out_ref[...] = out.astype(out_ref.dtype)

    return kernel


def generator_forward(params, x_btf, *, hidden_dim, num_layers):
    """Full Generator forward: stacked GRU -> Linear -> Sigmoid, one kernel."""
    B, T, F = x_btf.shape
    H = hidden_dim
    # Time-major flattened input: row t*B + b == x[b, t, :].
    x2d = jnp.transpose(x_btf, (1, 0, 2)).reshape(T * B, F)

    operands = [x2d, params["w_ix0"], params["w_h0"]]
    if num_layers > 1:
        operands.append(params["w_big"])
    operands += [params["biases"], params["w_lin"]]

    kernel = _make_generator_kernel(T, B, F, H, num_layers)
    out = pl.pallas_call(
        kernel,
        out_shape=jax.ShapeDtypeStruct((T * B, H), x_btf.dtype),
        in_specs=[pl.BlockSpec(memory_space=pltpu.MemorySpace.VMEM)
                  for _ in operands],
        out_specs=pl.BlockSpec(memory_space=pltpu.MemorySpace.VMEM),
    )(*operands)
    # Layout plumbing back to batch-first, outside the kernel (free).
    return out.reshape(T, B, H).transpose(1, 0, 2)                  # (B, T, H)


# ----------------------------------------------------------------------------
# Parameters: PyTorch-layout init + packing into the kernel's fused,
# lane-dense, bias-folded slabs.
# ----------------------------------------------------------------------------
def init_generator_params(key, input_features, hidden_dim, num_layers):
    """PyTorch-layout GRU + Linear params, uniform(-1/sqrt(H), 1/sqrt(H))."""
    k = float(hidden_dim) ** -0.5
    gru = []
    for layer in range(num_layers):
        in_dim = input_features if layer == 0 else hidden_dim
        key, k1, k2, k3, k4 = jax.random.split(key, 5)
        w_ih = jax.random.uniform(k1, (3 * hidden_dim, in_dim), jnp.float32, -k, k)
        w_hh = jax.random.uniform(k2, (3 * hidden_dim, hidden_dim), jnp.float32, -k, k)
        b_ih = jax.random.uniform(k3, (3 * hidden_dim,), jnp.float32, -k, k)
        b_hh = jax.random.uniform(k4, (3 * hidden_dim,), jnp.float32, -k, k)
        gru.append((w_ih, w_hh, b_ih, b_hh))
    key, k5, k6 = jax.random.split(key, 3)
    lin_w = jax.random.uniform(k5, (hidden_dim, hidden_dim), jnp.float32, -k, k)
    lin_b = jax.random.uniform(k6, (hidden_dim,), jnp.float32, -k, k)
    return {"gru": gru, "lin_w": lin_w, "lin_b": lin_b}


def pack_params(raw, input_features, hidden_dim, num_layers):
    """Build the kernel's fused slabs from PyTorch [r,z,n]-stacked params.

    Gate column layout of every fused (.., 4H) weight / bias: [r | z | n_x | n_h].
    """
    H = hidden_dim
    F = input_features
    f32 = jnp.float32

    def split_gates(w):  # w: (3H, in_dim) PyTorch layout -> per-gate (in_dim, H)
        return w[0:H].T, w[H:2 * H].T, w[2 * H:3 * H].T

    zH = jnp.zeros((H,), f32)
    zHH = jnp.zeros((H, H), f32)

    # Layer 0
    w_ih0, w_hh0, b_ih0, b_hh0 = raw["gru"][0]
    w_ir0, w_iz0, w_in0 = split_gates(w_ih0)                       # (F, H)
    w_hr0, w_hz0, w_hn0 = split_gates(w_hh0)                       # (H, H)
    w_ix0 = jnp.concatenate(
        [w_ir0, w_iz0, w_in0, jnp.zeros((F, H), f32)], axis=1)     # (F, 4H)
    w_h0 = jnp.concatenate([w_hr0, w_hz0, zHH, w_hn0], axis=1)     # (H, 4H)

    bias_rows = [
        jnp.concatenate([b_ih0[0:H] + b_hh0[0:H],
                         b_ih0[H:2 * H] + b_hh0[H:2 * H],
                         b_ih0[2 * H:3 * H], zH]),                 # folded into gx0
        jnp.concatenate([zH, zH, zH, b_hh0[2 * H:3 * H]]),         # added to gh0
    ]

    # Upper layers: fused [input; hidden] weight slab (2H, 4H) per layer.
    w_big_list = []
    for l in range(1, num_layers):
        w_ih, w_hh, b_ih, b_hh = raw["gru"][l]
        w_ir, w_iz, w_in_ = split_gates(w_ih)                      # (H, H)
        w_hr, w_hz, w_hn = split_gates(w_hh)                       # (H, H)
        top = jnp.concatenate([w_ir, w_iz, w_in_, zHH], axis=1)    # input part
        bot = jnp.concatenate([w_hr, w_hz, zHH, w_hn], axis=1)     # hidden part
        w_big_list.append(jnp.concatenate([top, bot], axis=0))     # (2H, 4H)
        bias_rows.append(jnp.concatenate(
            [b_ih[0:H] + b_hh[0:H], b_ih[H:2 * H] + b_hh[H:2 * H],
             b_ih[2 * H:3 * H], b_hh[2 * H:3 * H]]))

    # Head bias in the last bias row (kernel slices the first H lanes).
    bias_rows.append(jnp.concatenate([raw["lin_b"], zH, zH, zH]))

    params = {
        "w_ix0": w_ix0,
        "w_h0": w_h0,
        "biases": jnp.stack(bias_rows, axis=0),                    # (L+2, 4H)
        "w_lin": raw["lin_w"].T,                                   # (H, H)
    }
    if num_layers > 1:
        params["w_big"] = jnp.stack(w_big_list, axis=0)            # (L-1, 2H, 4H)
    return params


# ----------------------------------------------------------------------------
# Pure-JAX reference (PyTorch GRU equations) for a correctness check.
# ----------------------------------------------------------------------------
def _reference_forward(raw, x_btf, *, hidden_dim, num_layers):
    H = hidden_dim
    B, T, _ = x_btf.shape
    hp = jax.lax.Precision.HIGHEST
    h = [jnp.zeros((B, H), jnp.float32) for _ in range(num_layers)]
    outs = []
    for t in range(T):
        inp = x_btf[:, t, :]
        for l in range(num_layers):
            w_ih, w_hh, b_ih, b_hh = raw["gru"][l]
            gi = jnp.dot(inp, w_ih.T, precision=hp) + b_ih
            gh = jnp.dot(h[l], w_hh.T, precision=hp) + b_hh
            r = jax.nn.sigmoid(gi[:, :H] + gh[:, :H])
            z = jax.nn.sigmoid(gi[:, H:2 * H] + gh[:, H:2 * H])
            n = jnp.tanh(gi[:, 2 * H:] + r * gh[:, 2 * H:])
            h[l] = (1.0 - z) * n + z * h[l]
            inp = h[l]
        outs.append(jax.nn.sigmoid(
            jnp.dot(h[-1], raw["lin_w"].T, precision=hp) + raw["lin_b"]))
    return jnp.stack(outs, axis=1)  # (B, T, H)


if __name__ == "__main__":
    # Small shapes consistent with Generator(module_name='gru', ...)
    B, T, F, H, L = 2, 8, 4, 32, 2

    key = jax.random.PRNGKey(0)
    key, xkey = jax.random.split(key)
    x = jax.random.normal(xkey, (B, T, F), dtype=jnp.float32)

    raw = init_generator_params(key, input_features=F, hidden_dim=H, num_layers=L)
    params = pack_params(raw, input_features=F, hidden_dim=H, num_layers=L)

    fwd = jax.jit(functools.partial(generator_forward, hidden_dim=H, num_layers=L))
    out = fwd(params, x)
    jax.block_until_ready(out)

    assert out.shape == (B, T, H), out.shape
    assert bool(jnp.all(jnp.isfinite(out)))
    assert bool(jnp.all((out >= 0.0) & (out <= 1.0)))  # sigmoid output range

    ref_fn = jax.jit(functools.partial(_reference_forward, hidden_dim=H, num_layers=L))
    ref = ref_fn(raw, x)
    max_err = float(jnp.max(jnp.abs(out - ref)))
    assert max_err < 2e-3, f"max abs err vs reference: {max_err}"

    print("KERNEL_OK")
</pallas_src>

<mosaic_0001>
module attributes {stable_mosaic.version = 11 : i64} {
  func.func @kernel(%arg0: memref<16x4xf32, #tpu.memory_space<vmem>>, %arg1: memref<4x128xf32, #tpu.memory_space<vmem>>, %arg2: memref<32x128xf32, #tpu.memory_space<vmem>>, %arg3: memref<1x64x128xf32, #tpu.memory_space<vmem>>, %arg4: memref<4x128xf32, #tpu.memory_space<vmem>>, %arg5: memref<32x32xf32, #tpu.memory_space<vmem>>, %arg6: memref<16x32xf32, #tpu.memory_space<vmem>>) attributes {dimension_semantics = [], scalar_prefetch = 0 : i64, scratch_operands = 0 : i64, tpu.core_type = #tpu.core_type<tc>} {
    %c0 = arith.constant 0 : index
    %c0_0 = arith.constant 0 : index
    %0 = vector.load %arg4[%c0, %c0_0] : memref<4x128xf32, #tpu.memory_space<vmem>>, vector<1x128xf32>
    %c0_1 = arith.constant 0 : index
    %c0_2 = arith.constant 0 : index
    %1 = vector.load %arg0[%c0_1, %c0_2] : memref<16x4xf32, #tpu.memory_space<vmem>>, vector<16x4xf32>
    %c0_3 = arith.constant 0 : index
    %c0_4 = arith.constant 0 : index
    %2 = vector.load %arg1[%c0_3, %c0_4] : memref<4x128xf32, #tpu.memory_space<vmem>>, vector<4x128xf32>
    %cst = arith.constant dense<0.000000e+00> : vector<16x128xf32>
    %3 = tpu.matmul %1, %2, %cst {dimension_numbers = #tpu.dot_dimension_numbers<[1], [0], [0], [1], [0, 0, 1, 1], [], []>} : vector<16x4xf32>, vector<4x128xf32>, vector<16x128xf32> -> vector<16x128xf32>
    %4 = vector.broadcast %0 : vector<1x128xf32> to vector<16x128xf32>
    %5 = arith.addf %3, %4 : vector<16x128xf32>
    %c0_5 = arith.constant 0 : index
    %c0_6 = arith.constant 0 : index
    %6 = vector.load %arg2[%c0_5, %c0_6] : memref<32x128xf32, #tpu.memory_space<vmem>>, vector<32x128xf32>
    %c1 = arith.constant 1 : index
    %c0_7 = arith.constant 0 : index
    %7 = vector.load %arg4[%c1, %c0_7] : memref<4x128xf32, #tpu.memory_space<vmem>>, vector<1x128xf32>
    %c0_8 = arith.constant 0 : index
    %c0_9 = arith.constant 0 : index
    %c0_10 = arith.constant 0 : index
    %8 = vector.load %arg3[%c0_8, %c0_9, %c0_10] : memref<1x64x128xf32, #tpu.memory_space<vmem>>, vector<1x64x128xf32>
    %9 = vector.shape_cast %8 : vector<1x64x128xf32> to vector<64x128xf32>
    %c2 = arith.constant 2 : index
    %c0_11 = arith.constant 0 : index
    %10 = vector.load %arg4[%c2, %c0_11] : memref<4x128xf32, #tpu.memory_space<vmem>>, vector<1x128xf32>
    %cst_12 = arith.constant 0.000000e+00 : f32
    %11 = vector.broadcast %cst_12 : f32 to vector<2x32xf32>
    %cst_13 = arith.constant 0.000000e+00 : f32
    %12 = vector.broadcast %cst_13 : f32 to vector<2x32xf32>
    %13 = vector.extract_strided_slice %5 {offsets = [0, 0], sizes = [2, 128], strides = [1, 1]} : vector<16x128xf32> to vector<2x128xf32>
    %cst_14 = arith.constant dense<0.000000e+00> : vector<2x128xf32>
    %14 = tpu.matmul %11, %6, %cst_14 {dimension_numbers = #tpu.dot_dimension_numbers<[1], [0], [0], [1], [0, 0, 1, 1], [], []>} : vector<2x32xf32>, vector<32x128xf32>, vector<2x128xf32> -> vector<2x128xf32>
    %15 = arith.addf %13, %14 : vector<2x128xf32>
    %16 = vector.broadcast %7 : vector<1x128xf32> to vector<2x128xf32>
    %17 = arith.addf %15, %16 : vector<2x128xf32>
    %18 = vector.extract_strided_slice %17 {offsets = [0, 0], sizes = [2, 64], strides = [1, 1]} : vector<2x128xf32> to vector<2x64xf32>
    %19 = arith.negf %18 : vector<2x64xf32>
    %20 = math.exp %19 : vector<2x64xf32>
    %cst_15 = arith.constant 1.000000e+00 : f32
    %21 = vector.broadcast %cst_15 : f32 to vector<2x64xf32>
    %22 = arith.addf %21, %20 : vector<2x64xf32>
    %23 = arith.divf %21, %22 : vector<2x64xf32>
    %24 = vector.extract_strided_slice %23 {offsets = [0, 0], sizes = [2, 32], strides = [1, 1]} : vector<2x64xf32> to vector<2x32xf32>
    %25 = vector.extract_strided_slice %23 {offsets = [0, 32], sizes = [2, 32], strides = [1, 1]} : vector<2x64xf32> to vector<2x32xf32>
    %26 = vector.extract_strided_slice %17 {offsets = [0, 64], sizes = [2, 32], strides = [1, 1]} : vector<2x128xf32> to vector<2x32xf32>
    %27 = vector.extract_strided_slice %17 {offsets = [0, 96], sizes = [2, 32], strides = [1, 1]} : vector<2x128xf32> to vector<2x32xf32>
    %28 = arith.mulf %24, %27 : vector<2x32xf32>
    %29 = arith.addf %26, %28 : vector<2x32xf32>
    %30 = math.tanh %29 : vector<2x32xf32>
    %cst_16 = arith.constant 1.000000e+00 : f32
    %31 = vector.broadcast %cst_16 : f32 to vector<2x32xf32>
    %32 = arith.subf %31, %25 : vector<2x32xf32>
    %33 = arith.mulf %32, %30 : vector<2x32xf32>
    %34 = arith.mulf %25, %11 : vector<2x32xf32>
    %35 = arith.addf %33, %34 : vector<2x32xf32>
    %36 = tpu.concatenate %35, %12 in 1 : vector<2x32xf32>, vector<2x32xf32> -> vector<2x64xf32>
    %cst_17 = arith.constant dense<0.000000e+00> : vector<2x128xf32>
    %37 = tpu.matmul %36, %9, %cst_17 {dimension_numbers = #tpu.dot_dimension_numbers<[1], [0], [0], [1], [0, 0, 1, 1], [], []>} : vector<2x64xf32>, vector<64x128xf32>, vector<2x128xf32> -> vector<2x128xf32>
    %38 = vector.broadcast %10 : vector<1x128xf32> to vector<2x128xf32>
    %39 = arith.addf %37, %38 : vector<2x128xf32>
    %40 = vector.extract_strided_slice %39 {offsets = [0, 0], sizes = [2, 64], strides = [1, 1]} : vector<2x128xf32> to vector<2x64xf32>
    %41 = arith.negf %40 : vector<2x64xf32>
    %42 = math.exp %41 : vector<2x64xf32>
    %cst_18 = arith.constant 1.000000e+00 : f32
    %43 = vector.broadcast %cst_18 : f32 to vector<2x64xf32>
    %44 = arith.addf %43, %42 : vector<2x64xf32>
    %45 = arith.divf %43, %44 : vector<2x64xf32>
    %46 = vector.extract_strided_slice %45 {offsets = [0, 0], sizes = [2, 32], strides = [1, 1]} : vector<2x64xf32> to vector<2x32xf32>
    %47 = vector.extract_strided_slice %45 {offsets = [0, 32], sizes = [2, 32], strides = [1, 1]} : vector<2x64xf32> to vector<2x32xf32>
    %48 = vector.extract_strided_slice %39 {offsets = [0, 64], sizes = [2, 32], strides = [1, 1]} : vector<2x128xf32> to vector<2x32xf32>
    %49 = vector.extract_strided_slice %39 {offsets = [0, 96], sizes = [2, 32], strides = [1, 1]} : vector<2x128xf32> to vector<2x32xf32>
    %50 = arith.mulf %46, %49 : vector<2x32xf32>
    %51 = arith.addf %48, %50 : vector<2x32xf32>
    %52 = math.tanh %51 : vector<2x32xf32>
    %cst_19 = arith.constant 1.000000e+00 : f32
    %53 = vector.broadcast %cst_19 : f32 to vector<2x32xf32>
    %54 = arith.subf %53, %47 : vector<2x32xf32>
    %55 = arith.mulf %54, %52 : vector<2x32xf32>
    %56 = arith.mulf %47, %12 : vector<2x32xf32>
    %57 = arith.addf %55, %56 : vector<2x32xf32>
    %58 = vector.extract_strided_slice %5 {offsets = [2, 0], sizes = [2, 128], strides = [1, 1]} : vector<16x128xf32> to vector<2x128xf32>
    %cst_20 = arith.constant dense<0.000000e+00> : vector<2x128xf32>
    %59 = tpu.matmul %35, %6, %cst_20 {dimension_numbers = #tpu.dot_dimension_numbers<[1], [0], [0], [1], [0, 0, 1, 1], [], []>} : vector<2x32xf32>, vector<32x128xf32>, vector<2x128xf32> -> vector<2x128xf32>
    %60 = arith.addf %58, %59 : vector<2x128xf32>
    %61 = vector.broadcast %7 : vector<1x128xf32> to vector<2x128xf32>
    %62 = arith.addf %60, %61 : vector<2x128xf32>
    %63 = vector.extract_strided_slice %62 {offsets = [0, 0], sizes = [2, 64], strides = [1, 1]} : vector<2x128xf32> to vector<2x64xf32>
    %64 = arith.negf %63 : vector<2x64xf32>
    %65 = math.exp %64 : vector<2x64xf32>
    %cst_21 = arith.constant 1.000000e+00 : f32
    %66 = vector.broadcast %cst_21 : f32 to vector<2x64xf32>
    %67 = arith.addf %66, %65 : vector<2x64xf32>
    %68 = arith.divf %66, %67 : vector<2x64xf32>
    %69 = vector.extract_strided_slice %68 {offsets = [0, 0], sizes = [2, 32], strides = [1, 1]} : vector<2x64xf32> to vector<2x32xf32>
    %70 = vector.extract_strided_slice %68 {offsets = [0, 32], sizes = [2, 32], strides = [1, 1]} : vector<2x64xf32> to vector<2x32xf32>
    %71 = vector.extract_strided_slice %62 {offsets = [0, 64], sizes = [2, 32], strides = [1, 1]} : vector<2x128xf32> to vector<2x32xf32>
    %72 = vector.extract_strided_slice %62 {offsets = [0, 96], sizes = [2, 32], strides = [1, 1]} : vector<2x128xf32> to vector<2x32xf32>
    %73 = arith.mulf %69, %72 : vector<2x32xf32>
    %74 = arith.addf %71, %73 : vector<2x32xf32>
    %75 = math.tanh %74 : vector<2x32xf32>
    %cst_22 = arith.constant 1.000000e+00 : f32
    %76 = vector.broadcast %cst_22 : f32 to vector<2x32xf32>
    %77 = arith.subf %76, %70 : vector<2x32xf32>
    %78 = arith.mulf %77, %75 : vector<2x32xf32>
    %79 = arith.mulf %70, %35 : vector<2x32xf32>
    %80 = arith.addf %78, %79 : vector<2x32xf32>
    %81 = tpu.concatenate %80, %57 in 1 : vector<2x32xf32>, vector<2x32xf32> -> vector<2x64xf32>
    %cst_23 = arith.constant dense<0.000000e+00> : vector<2x128xf32>
    %82 = tpu.matmul %81, %9, %cst_23 {dimension_numbers = #tpu.dot_dimension_numbers<[1], [0], [0], [1], [0, 0, 1, 1], [], []>} : vector<2x64xf32>, vector<64x128xf32>, vector<2x128xf32> -> vector<2x128xf32>
    %83 = vector.broadcast %10 : vector<1x128xf32> to vector<2x128xf32>
    %84 = arith.addf %82, %83 : vector<2x128xf32>
    %85 = vector.extract_strided_slice %84 {offsets = [0, 0], sizes = [2, 64], strides = [1, 1]} : vector<2x128xf32> to vector<2x64xf32>
    %86 = arith.negf %85 : vector<2x64xf32>
    %87 = math.exp %86 : vector<2x64xf32>
    %cst_24 = arith.constant 1.000000e+00 : f32
    %88 = vector.broadcast %cst_24 : f32 to vector<2x64xf32>
    %89 = arith.addf %88, %87 : vector<2x64xf32>
    %90 = arith.divf %88, %89 : vector<2x64xf32>
    %91 = vector.extract_strided_slice %90 {offsets = [0, 0], sizes = [2, 32], strides = [1, 1]} : vector<2x64xf32> to vector<2x32xf32>
    %92 = vector.extract_strided_slice %90 {offsets = [0, 32], sizes = [2, 32], strides = [1, 1]} : vector<2x64xf32> to vector<2x32xf32>
    %93 = vector.extract_strided_slice %84 {offsets = [0, 64], sizes = [2, 32], strides = [1, 1]} : vector<2x128xf32> to vector<2x32xf32>
    %94 = vector.extract_strided_slice %84 {offsets = [0, 96], sizes = [2, 32], strides = [1, 1]} : vector<2x128xf32> to vector<2x32xf32>
    %95 = arith.mulf %91, %94 : vector<2x32xf32>
    %96 = arith.addf %93, %95 : vector<2x32xf32>
    %97 = math.tanh %96 : vector<2x32xf32>
    %cst_25 = arith.constant 1.000000e+00 : f32
    %98 = vector.broadcast %cst_25 : f32 to vector<2x32xf32>
    %99 = arith.subf %98, %92 : vector<2x32xf32>
    %100 = arith.mulf %99, %97 : vector<2x32xf32>
    %101 = arith.mulf %92, %57 : vector<2x32xf32>
    %102 = arith.addf %100, %101 : vector<2x32xf32>
    %103 = vector.extract_strided_slice %5 {offsets = [4, 0], sizes = [2, 128], strides = [1, 1]} : vector<16x128xf32> to vector<2x128xf32>
    %cst_26 = arith.constant dense<0.000000e+00> : vector<2x128xf32>
    %104 = tpu.matmul %80, %6, %cst_26 {dimension_numbers = #tpu.dot_dimension_numbers<[1], [0], [0], [1], [0, 0, 1, 1], [], []>} : vector<2x32xf32>, vector<32x128xf32>, vector<2x128xf32> -> vector<2x128xf32>
    %105 = arith.addf %103, %104 : vector<2x128xf32>
    %106 = vector.broadcast %7 : vector<1x128xf32> to vector<2x128xf32>
    %107 = arith.addf %105, %106 : vector<2x128xf32>
    %108 = vector.extract_strided_slice %107 {offsets = [0, 0], sizes = [2, 64], strides = [1, 1]} : vector<2x128xf32> to vector<2x64xf32>
    %109 = arith.negf %108 : vector<2x64xf32>
    %110 = math.exp %109 : vector<2x64xf32>
    %cst_27 = arith.constant 1.000000e+00 : f32
    %111 = vector.broadcast %cst_27 : f32 to vector<2x64xf32>
    %112 = arith.addf %111, %110 : vector<2x64xf32>
    %113 = arith.divf %111, %112 : vector<2x64xf32>
    %114 = vector.extract_strided_slice %113 {offsets = [0, 0], sizes = [2, 32], strides = [1, 1]} : vector<2x64xf32> to vector<2x32xf32>
    %115 = vector.extract_strided_slice %113 {offsets = [0, 32], sizes = [2, 32], strides = [1, 1]} : vector<2x64xf32> to vector<2x32xf32>
    %116 = vector.extract_strided_slice %107 {offsets = [0, 64], sizes = [2, 32], strides = [1, 1]} : vector<2x128xf32> to vector<2x32xf32>
    %117 = vector.extract_strided_slice %107 {offsets = [0, 96], sizes = [2, 32], strides = [1, 1]} : vector<2x128xf32> to vector<2x32xf32>
    %118 = arith.mulf %114, %117 : vector<2x32xf32>
    %119 = arith.addf %116, %118 : vector<2x32xf32>
    %120 = math.tanh %119 : vector<2x32xf32>
    %cst_28 = arith.constant 1.000000e+00 : f32
    %121 = vector.broadcast %cst_28 : f32 to vector<2x32xf32>
    %122 = arith.subf %121, %115 : vector<2x32xf32>
    %123 = arith.mulf %122, %120 : vector<2x32xf32>
    %124 = arith.mulf %115, %80 : vector<2x32xf32>
    %125 = arith.addf %123, %124 : vector<2x32xf32>
    %126 = tpu.concatenate %125, %102 in 1 : vector<2x32xf32>, vector<2x32xf32> -> vector<2x64xf32>
    %cst_29 = arith.constant dense<0.000000e+00> : vector<2x128xf32>
    %127 = tpu.matmul %126, %9, %cst_29 {dimension_numbers = #tpu.dot_dimension_numbers<[1], [0], [0], [1], [0, 0, 1, 1], [], []>} : vector<2x64xf32>, vector<64x128xf32>, vector<2x128xf32> -> vector<2x128xf32>
    %128 = vector.broadcast %10 : vector<1x128xf32> to vector<2x128xf32>
    %129 = arith.addf %127, %128 : vector<2x128xf32>
    %130 = vector.extract_strided_slice %129 {offsets = [0, 0], sizes = [2, 64], strides = [1, 1]} : vector<2x128xf32> to vector<2x64xf32>
    %131 = arith.negf %130 : vector<2x64xf32>
    %132 = math.exp %131 : vector<2x64xf32>
    %cst_30 = arith.constant 1.000000e+00 : f32
    %133 = vector.broadcast %cst_30 : f32 to vector<2x64xf32>
    %134 = arith.addf %133, %132 : vector<2x64xf32>
    %135 = arith.divf %133, %134 : vector<2x64xf32>
    %136 = vector.extract_strided_slice %135 {offsets = [0, 0], sizes = [2, 32], strides = [1, 1]} : vector<2x64xf32> to vector<2x32xf32>
    %137 = vector.extract_strided_slice %135 {offsets = [0, 32], sizes = [2, 32], strides = [1, 1]} : vector<2x64xf32> to vector<2x32xf32>
    %138 = vector.extract_strided_slice %129 {offsets = [0, 64], sizes = [2, 32], strides = [1, 1]} : vector<2x128xf32> to vector<2x32xf32>
    %139 = vector.extract_strided_slice %129 {offsets = [0, 96], sizes = [2, 32], strides = [1, 1]} : vector<2x128xf32> to vector<2x32xf32>
    %140 = arith.mulf %136, %139 : vector<2x32xf32>
    %141 = arith.addf %138, %140 : vector<2x32xf32>
    %142 = math.tanh %141 : vector<2x32xf32>
    %cst_31 = arith.constant 1.000000e+00 : f32
    %143 = vector.broadcast %cst_31 : f32 to vector<2x32xf32>
    %144 = arith.subf %143, %137 : vector<2x32xf32>
    %145 = arith.mulf %144, %142 : vector<2x32xf32>
    %146 = arith.mulf %137, %102 : vector<2x32xf32>
    %147 = arith.addf %145, %146 : vector<2x32xf32>
    %148 = vector.extract_strided_slice %5 {offsets = [6, 0], sizes = [2, 128], strides = [1, 1]} : vector<16x128xf32> to vector<2x128xf32>
    %cst_32 = arith.constant dense<0.000000e+00> : vector<2x128xf32>
    %149 = tpu.matmul %125, %6, %cst_32 {dimension_numbers = #tpu.dot_dimension_numbers<[1], [0], [0], [1], [0, 0, 1, 1], [], []>} : vector<2x32xf32>, vector<32x128xf32>, vector<2x128xf32> -> vector<2x128xf32>
    %150 = arith.addf %148, %149 : vector<2x128xf32>
    %151 = vector.broadcast %7 : vector<1x128xf32> to vector<2x128xf32>
    %152 = arith.addf %150, %151 : vector<2x128xf32>
    %153 = vector.extract_strided_slice %152 {offsets = [0, 0], sizes = [2, 64], strides = [1, 1]} : vector<2x128xf32> to vector<2x64xf32>
    %154 = arith.negf %153 : vector<2x64xf32>
    %155 = math.exp %154 : vector<2x64xf32>
    %cst_33 = arith.constant 1.000000e+00 : f32
    %156 = vector.broadcast %cst_33 : f32 to vector<2x64xf32>
    %157 = arith.addf %156, %155 : vector<2x64xf32>
    %158 = arith.divf %156, %157 : vector<2x64xf32>
    %159 = vector.extract_strided_slice %158 {offsets = [0, 0], sizes = [2, 32], strides = [1, 1]} : vector<2x64xf32> to vector<2x32xf32>
    %160 = vector.extract_strided_slice %158 {offsets = [0, 32], sizes = [2, 32], strides = [1, 1]} : vector<2x64xf32> to vector<2x32xf32>
    %161 = vector.extract_strided_slice %152 {offsets = [0, 64], sizes = [2, 32], strides = [1, 1]} : vector<2x128xf32> to vector<2x32xf32>
    %162 = vector.extract_strided_slice %152 {offsets = [0, 96], sizes = [2, 32], strides = [1, 1]} : vector<2x128xf32> to vector<2x32xf32>
    %163 = arith.mulf %159, %162 : vector<2x32xf32>
    %164 = arith.addf %161, %163 : vector<2x32xf32>
    %165 = math.tanh %164 : vector<2x32xf32>
    %cst_34 = arith.constant 1.000000e+00 : f32
    %166 = vector.broadcast %cst_34 : f32 to vector<2x32xf32>
    %167 = arith.subf %166, %160 : vector<2x32xf32>
    %168 = arith.mulf %167, %165 : vector<2x32xf32>
    %169 = arith.mulf %160, %125 : vector<2x32xf32>
    %170 = arith.addf %168, %169 : vector<2x32xf32>
    %171 = tpu.concatenate %170, %147 in 1 : vector<2x32xf32>, vector<2x32xf32> -> vector<2x64xf32>
    %cst_35 = arith.constant dense<0.000000e+00> : vector<2x128xf32>
    %172 = tpu.matmul %171, %9, %cst_35 {dimension_numbers = #tpu.dot_dimension_numbers<[1], [0], [0], [1], [0, 0, 1, 1], [], []>} : vector<2x64xf32>, vector<64x128xf32>, vector<2x128xf32> -> vector<2x128xf32>
    %173 = vector.broadcast %10 : vector<1x128xf32> to vector<2x128xf32>
    %174 = arith.addf %172, %173 : vector<2x128xf32>
    %175 = vector.extract_strided_slice %174 {offsets = [0, 0], sizes = [2, 64], strides = [1, 1]} : vector<2x128xf32> to vector<2x64xf32>
    %176 = arith.negf %175 : vector<2x64xf32>
    %177 = math.exp %176 : vector<2x64xf32>
    %cst_36 = arith.constant 1.000000e+00 : f32
    %178 = vector.broadcast %cst_36 : f32 to vector<2x64xf32>
    %179 = arith.addf %178, %177 : vector<2x64xf32>
    %180 = arith.divf %178, %179 : vector<2x64xf32>
    %181 = vector.extract_strided_slice %180 {offsets = [0, 0], sizes = [2, 32], strides = [1, 1]} : vector<2x64xf32> to vector<2x32xf32>
    %182 = vector.extract_strided_slice %180 {offsets = [0, 32], sizes = [2, 32], strides = [1, 1]} : vector<2x64xf32> to vector<2x32xf32>
    %183 = vector.extract_strided_slice %174 {offsets = [0, 64], sizes = [2, 32], strides = [1, 1]} : vector<2x128xf32> to vector<2x32xf32>
    %184 = vector.extract_strided_slice %174 {offsets = [0, 96], sizes = [2, 32], strides = [1, 1]} : vector<2x128xf32> to vector<2x32xf32>
    %185 = arith.mulf %181, %184 : vector<2x32xf32>
    %186 = arith.addf %183, %185 : vector<2x32xf32>
    %187 = math.tanh %186 : vector<2x32xf32>
    %cst_37 = arith.constant 1.000000e+00 : f32
    %188 = vector.broadcast %cst_37 : f32 to vector<2x32xf32>
    %189 = arith.subf %188, %182 : vector<2x32xf32>
    %190 = arith.mulf %189, %187 : vector<2x32xf32>
    %191 = arith.mulf %182, %147 : vector<2x32xf32>
    %192 = arith.addf %190, %191 : vector<2x32xf32>
    %193 = vector.extract_strided_slice %5 {offsets = [8, 0], sizes = [2, 128], strides = [1, 1]} : vector<16x128xf32> to vector<2x128xf32>
    %cst_38 = arith.constant dense<0.000000e+00> : vector<2x128xf32>
    %194 = tpu.matmul %170, %6, %cst_38 {dimension_numbers = #tpu.dot_dimension_numbers<[1], [0], [0], [1], [0, 0, 1, 1], [], []>} : vector<2x32xf32>, vector<32x128xf32>, vector<2x128xf32> -> vector<2x128xf32>
    %195 = arith.addf %193, %194 : vector<2x128xf32>
    %196 = vector.broadcast %7 : vector<1x128xf32> to vector<2x128xf32>
    %197 = arith.addf %195, %196 : vector<2x128xf32>
    %198 = vector.extract_strided_slice %197 {offsets = [0, 0], sizes = [2, 64], strides = [1, 1]} : vector<2x128xf32> to vector<2x64xf32>
    %199 = arith.negf %198 : vector<2x64xf32>
    %200 = math.exp %199 : vector<2x64xf32>
    %cst_39 = arith.constant 1.000000e+00 : f32
    %201 = vector.broadcast %cst_39 : f32 to vector<2x64xf32>
    %202 = arith.addf %201, %200 : vector<2x64xf32>
    %203 = arith.divf %201, %202 : vector<2x64xf32>
    %204 = vector.extract_strided_slice %203 {offsets = [0, 0], sizes = [2, 32], strides = [1, 1]} : vector<2x64xf32> to vector<2x32xf32>
    %205 = vector.extract_strided_slice %203 {offsets = [0, 32], sizes = [2, 32], strides = [1, 1]} : vector<2x64xf32> to vector<2x32xf32>
    %206 = vector.extract_strided_slice %197 {offsets = [0, 64], sizes = [2, 32], strides = [1, 1]} : vector<2x128xf32> to vector<2x32xf32>
    %207 = vector.extract_strided_slice %197 {offsets = [0, 96], sizes = [2, 32], strides = [1, 1]} : vector<2x128xf32> to vector<2x32xf32>
    %208 = arith.mulf %204, %207 : vector<2x32xf32>
    %209 = arith.addf %206, %208 : vector<2x32xf32>
    %210 = math.tanh %209 : vector<2x32xf32>
    %cst_40 = arith.constant 1.000000e+00 : f32
    %211 = vector.broadcast %cst_40 : f32 to vector<2x32xf32>
    %212 = arith.subf %211, %205 : vector<2x32xf32>
    %213 = arith.mulf %212, %210 : vector<2x32xf32>
    %214 = arith.mulf %205, %170 : vector<2x32xf32>
    %215 = arith.addf %213, %214 : vector<2x32xf32>
    %216 = tpu.concatenate %215, %192 in 1 : vector<2x32xf32>, vector<2x32xf32> -> vector<2x64xf32>
    %cst_41 = arith.constant dense<0.000000e+00> : vector<2x128xf32>
    %217 = tpu.matmul %216, %9, %cst_41 {dimension_numbers = #tpu.dot_dimension_numbers<[1], [0], [0], [1], [0, 0, 1, 1], [], []>} : vector<2x64xf32>, vector<64x128xf32>, vector<2x128xf32> -> vector<2x128xf32>
    %218 = vector.broadcast %10 : vector<1x128xf32> to vector<2x128xf32>
    %219 = arith.addf %217, %218 : vector<2x128xf32>
    %220 = vector.extract_strided_slice %219 {offsets = [0, 0], sizes = [2, 64], strides = [1, 1]} : vector<2x128xf32> to vector<2x64xf32>
    %221 = arith.negf %220 : vector<2x64xf32>
    %222 = math.exp %221 : vector<2x64xf32>
    %cst_42 = arith.constant 1.000000e+00 : f32
    %223 = vector.broadcast %cst_42 : f32 to vector<2x64xf32>
    %224 = arith.addf %223, %222 : vector<2x64xf32>
    %225 = arith.divf %223, %224 : vector<2x64xf32>
    %226 = vector.extract_strided_slice %225 {offsets = [0, 0], sizes = [2, 32], strides = [1, 1]} : vector<2x64xf32> to vector<2x32xf32>
    %227 = vector.extract_strided_slice %225 {offsets = [0, 32], sizes = [2, 32], strides = [1, 1]} : vector<2x64xf32> to vector<2x32xf32>
    %228 = vector.extract_strided_slice %219 {offsets = [0, 64], sizes = [2, 32], strides = [1, 1]} : vector<2x128xf32> to vector<2x32xf32>
    %229 = vector.extract_strided_slice %219 {offsets = [0, 96], sizes = [2, 32], strides = [1, 1]} : vector<2x128xf32> to vector<2x32xf32>
    %230 = arith.mulf %226, %229 : vector<2x32xf32>
    %231 = arith.addf %228, %230 : vector<2x32xf32>
    %232 = math.tanh %231 : vector<2x32xf32>
    %cst_43 = arith.constant 1.000000e+00 : f32
    %233 = vector.broadcast %cst_43 : f32 to vector<2x32xf32>
    %234 = arith.subf %233, %227 : vector<2x32xf32>
    %235 = arith.mulf %234, %232 : vector<2x32xf32>
    %236 = arith.mulf %227, %192 : vector<2x32xf32>
    %237 = arith.addf %235, %236 : vector<2x32xf32>
    %238 = vector.extract_strided_slice %5 {offsets = [10, 0], sizes = [2, 128], strides = [1, 1]} : vector<16x128xf32> to vector<2x128xf32>
    %cst_44 = arith.constant dense<0.000000e+00> : vector<2x128xf32>
    %239 = tpu.matmul %215, %6, %cst_44 {dimension_numbers = #tpu.dot_dimension_numbers<[1], [0], [0], [1], [0, 0, 1, 1], [], []>} : vector<2x32xf32>, vector<32x128xf32>, vector<2x128xf32> -> vector<2x128xf32>
    %240 = arith.addf %238, %239 : vector<2x128xf32>
    %241 = vector.broadcast %7 : vector<1x128xf32> to vector<2x128xf32>
    %242 = arith.addf %240, %241 : vector<2x128xf32>
    %243 = vector.extract_strided_slice %242 {offsets = [0, 0], sizes = [2, 64], strides = [1, 1]} : vector<2x128xf32> to vector<2x64xf32>
    %244 = arith.negf %243 : vector<2x64xf32>
    %245 = math.exp %244 : vector<2x64xf32>
    %cst_45 = arith.constant 1.000000e+00 : f32
    %246 = vector.broadcast %cst_45 : f32 to vector<2x64xf32>
    %247 = arith.addf %246, %245 : vector<2x64xf32>
    %248 = arith.divf %246, %247 : vector<2x64xf32>
    %249 = vector.extract_strided_slice %248 {offsets = [0, 0], sizes = [2, 32], strides = [1, 1]} : vector<2x64xf32> to vector<2x32xf32>
    %250 = vector.extract_strided_slice %248 {offsets = [0, 32], sizes = [2, 32], strides = [1, 1]} : vector<2x64xf32> to vector<2x32xf32>
    %251 = vector.extract_strided_slice %242 {offsets = [0, 64], sizes = [2, 32], strides = [1, 1]} : vector<2x128xf32> to vector<2x32xf32>
    %252 = vector.extract_strided_slice %242 {offsets = [0, 96], sizes = [2, 32], strides = [1, 1]} : vector<2x128xf32> to vector<2x32xf32>
    %253 = arith.mulf %249, %252 : vector<2x32xf32>
    %254 = arith.addf %251, %253 : vector<2x32xf32>
    %255 = math.tanh %254 : vector<2x32xf32>
    %cst_46 = arith.constant 1.000000e+00 : f32
    %256 = vector.broadcast %cst_46 : f32 to vector<2x32xf32>
    %257 = arith.subf %256, %250 : vector<2x32xf32>
    %258 = arith.mulf %257, %255 : vector<2x32xf32>
    %259 = arith.mulf %250, %215 : vector<2x32xf32>
    %260 = arith.addf %258, %259 : vector<2x32xf32>
    %261 = tpu.concatenate %260, %237 in 1 : vector<2x32xf32>, vector<2x32xf32> -> vector<2x64xf32>
    %cst_47 = arith.constant dense<0.000000e+00> : vector<2x128xf32>
    %262 = tpu.matmul %261, %9, %cst_47 {dimension_numbers = #tpu.dot_dimension_numbers<[1], [0], [0], [1], [0, 0, 1, 1], [], []>} : vector<2x64xf32>, vector<64x128xf32>, vector<2x128xf32> -> vector<2x128xf32>
    %263 = vector.broadcast %10 : vector<1x128xf32> to vector<2x128xf32>
    %264 = arith.addf %262, %263 : vector<2x128xf32>
    %265 = vector.extract_strided_slice %264 {offsets = [0, 0], sizes = [2, 64], strides = [1, 1]} : vector<2x128xf32> to vector<2x64xf32>
    %266 = arith.negf %265 : vector<2x64xf32>
    %267 = math.exp %266 : vector<2x64xf32>
    %cst_48 = arith.constant 1.000000e+00 : f32
    %268 = vector.broadcast %cst_48 : f32 to vector<2x64xf32>
    %269 = arith.addf %268, %267 : vector<2x64xf32>
    %270 = arith.divf %268, %269 : vector<2x64xf32>
    %271 = vector.extract_strided_slice %270 {offsets = [0, 0], sizes = [2, 32], strides = [1, 1]} : vector<2x64xf32> to vector<2x32xf32>
    %272 = vector.extract_strided_slice %270 {offsets = [0, 32], sizes = [2, 32], strides = [1, 1]} : vector<2x64xf32> to vector<2x32xf32>
    %273 = vector.extract_strided_slice %264 {offsets = [0, 64], sizes = [2, 32], strides = [1, 1]} : vector<2x128xf32> to vector<2x32xf32>
    %274 = vector.extract_strided_slice %264 {offsets = [0, 96], sizes = [2, 32], strides = [1, 1]} : vector<2x128xf32> to vector<2x32xf32>
    %275 = arith.mulf %271, %274 : vector<2x32xf32>
    %276 = arith.addf %273, %275 : vector<2x32xf32>
    %277 = math.tanh %276 : vector<2x32xf32>
    %cst_49 = arith.constant 1.000000e+00 : f32
    %278 = vector.broadcast %cst_49 : f32 to vector<2x32xf32>
    %279 = arith.subf %278, %272 : vector<2x32xf32>
    %280 = arith.mulf %279, %277 : vector<2x32xf32>
    %281 = arith.mulf %272, %237 : vector<2x32xf32>
    %282 = arith.addf %280, %281 : vector<2x32xf32>
    %283 = vector.extract_strided_slice %5 {offsets = [12, 0], sizes = [2, 128], strides = [1, 1]} : vector<16x128xf32> to vector<2x128xf32>
    %cst_50 = arith.constant dense<0.000000e+00> : vector<2x128xf32>
    %284 = tpu.matmul %260, %6, %cst_50 {dimension_numbers = #tpu.dot_dimension_numbers<[1], [0], [0], [1], [0, 0, 1, 1], [], []>} : vector<2x32xf32>, vector<32x128xf32>, vector<2x128xf32> -> vector<2x128xf32>
    %285 = arith.addf %283, %284 : vector<2x128xf32>
    %286 = vector.broadcast %7 : vector<1x128xf32> to vector<2x128xf32>
    %287 = arith.addf %285, %286 : vector<2x128xf32>
    %288 = vector.extract_strided_slice %287 {offsets = [0, 0], sizes = [2, 64], strides = [1, 1]} : vector<2x128xf32> to vector<2x64xf32>
    %289 = arith.negf %288 : vector<2x64xf32>
    %290 = math.exp %289 : vector<2x64xf32>
    %cst_51 = arith.constant 1.000000e+00 : f32
    %291 = vector.broadcast %cst_51 : f32 to vector<2x64xf32>
    %292 = arith.addf %291, %290 : vector<2x64xf32>
    %293 = arith.divf %291, %292 : vector<2x64xf32>
    %294 = vector.extract_strided_slice %293 {offsets = [0, 0], sizes = [2, 32], strides = [1, 1]} : vector<2x64xf32> to vector<2x32xf32>
    %295 = vector.extract_strided_slice %293 {offsets = [0, 32], sizes = [2, 32], strides = [1, 1]} : vector<2x64xf32> to vector<2x32xf32>
    %296 = vector.extract_strided_slice %287 {offsets = [0, 64], sizes = [2, 32], strides = [1, 1]} : vector<2x128xf32> to vector<2x32xf32>
    %297 = vector.extract_strided_slice %287 {offsets = [0, 96], sizes = [2, 32], strides = [1, 1]} : vector<2x128xf32> to vector<2x32xf32>
    %298 = arith.mulf %294, %297 : vector<2x32xf32>
    %299 = arith.addf %296, %298 : vector<2x32xf32>
    %300 = math.tanh %299 : vector<2x32xf32>
    %cst_52 = arith.constant 1.000000e+00 : f32
    %301 = vector.broadcast %cst_52 : f32 to vector<2x32xf32>
    %302 = arith.subf %301, %295 : vector<2x32xf32>
    %303 = arith.mulf %302, %300 : vector<2x32xf32>
    %304 = arith.mulf %295, %260 : vector<2x32xf32>
    %305 = arith.addf %303, %304 : vector<2x32xf32>
    %306 = tpu.concatenate %305, %282 in 1 : vector<2x32xf32>, vector<2x32xf32> -> vector<2x64xf32>
    %cst_53 = arith.constant dense<0.000000e+00> : vector<2x128xf32>
    %307 = tpu.matmul %306, %9, %cst_53 {dimension_numbers = #tpu.dot_dimension_numbers<[1], [0], [0], [1], [0, 0, 1, 1], [], []>} : vector<2x64xf32>, vector<64x128xf32>, vector<2x128xf32> -> vector<2x128xf32>
    %308 = vector.broadcast %10 : vector<1x128xf32> to vector<2x128xf32>
    %309 = arith.addf %307, %308 : vector<2x128xf32>
    %310 = vector.extract_strided_slice %309 {offsets = [0, 0], sizes = [2, 64], strides = [1, 1]} : vector<2x128xf32> to vector<2x64xf32>
    %311 = arith.negf %310 : vector<2x64xf32>
    %312 = math.exp %311 : vector<2x64xf32>
    %cst_54 = arith.constant 1.000000e+00 : f32
    %313 = vector.broadcast %cst_54 : f32 to vector<2x64xf32>
    %314 = arith.addf %313, %312 : vector<2x64xf32>
    %315 = arith.divf %313, %314 : vector<2x64xf32>
    %316 = vector.extract_strided_slice %315 {offsets = [0, 0], sizes = [2, 32], strides = [1, 1]} : vector<2x64xf32> to vector<2x32xf32>
    %317 = vector.extract_strided_slice %315 {offsets = [0, 32], sizes = [2, 32], strides = [1, 1]} : vector<2x64xf32> to vector<2x32xf32>
    %318 = vector.extract_strided_slice %309 {offsets = [0, 64], sizes = [2, 32], strides = [1, 1]} : vector<2x128xf32> to vector<2x32xf32>
    %319 = vector.extract_strided_slice %309 {offsets = [0, 96], sizes = [2, 32], strides = [1, 1]} : vector<2x128xf32> to vector<2x32xf32>
    %320 = arith.mulf %316, %319 : vector<2x32xf32>
    %321 = arith.addf %318, %320 : vector<2x32xf32>
    %322 = math.tanh %321 : vector<2x32xf32>
    %cst_55 = arith.constant 1.000000e+00 : f32
    %323 = vector.broadcast %cst_55 : f32 to vector<2x32xf32>
    %324 = arith.subf %323, %317 : vector<2x32xf32>
    %325 = arith.mulf %324, %322 : vector<2x32xf32>
    %326 = arith.mulf %317, %282 : vector<2x32xf32>
    %327 = arith.addf %325, %326 : vector<2x32xf32>
    %328 = vector.extract_strided_slice %5 {offsets = [14, 0], sizes = [2, 128], strides = [1, 1]} : vector<16x128xf32> to vector<2x128xf32>
    %cst_56 = arith.constant dense<0.000000e+00> : vector<2x128xf32>
    %329 = tpu.matmul %305, %6, %cst_56 {dimension_numbers = #tpu.dot_dimension_numbers<[1], [0], [0], [1], [0, 0, 1, 1], [], []>} : vector<2x32xf32>, vector<32x128xf32>, vector<2x128xf32> -> vector<2x128xf32>
    %330 = arith.addf %328, %329 : vector<2x128xf32>
    %331 = vector.broadcast %7 : vector<1x128xf32> to vector<2x128xf32>
    %332 = arith.addf %330, %331 : vector<2x128xf32>
    %333 = vector.extract_strided_slice %332 {offsets = [0, 0], sizes = [2, 64], strides = [1, 1]} : vector<2x128xf32> to vector<2x64xf32>
    %334 = arith.negf %333 : vector<2x64xf32>
    %335 = math.exp %334 : vector<2x64xf32>
    %cst_57 = arith.constant 1.000000e+00 : f32
    %336 = vector.broadcast %cst_57 : f32 to vector<2x64xf32>
    %337 = arith.addf %336, %335 : vector<2x64xf32>
    %338 = arith.divf %336, %337 : vector<2x64xf32>
    %339 = vector.extract_strided_slice %338 {offsets = [0, 0], sizes = [2, 32], strides = [1, 1]} : vector<2x64xf32> to vector<2x32xf32>
    %340 = vector.extract_strided_slice %338 {offsets = [0, 32], sizes = [2, 32], strides = [1, 1]} : vector<2x64xf32> to vector<2x32xf32>
    %341 = vector.extract_strided_slice %332 {offsets = [0, 64], sizes = [2, 32], strides = [1, 1]} : vector<2x128xf32> to vector<2x32xf32>
    %342 = vector.extract_strided_slice %332 {offsets = [0, 96], sizes = [2, 32], strides = [1, 1]} : vector<2x128xf32> to vector<2x32xf32>
    %343 = arith.mulf %339, %342 : vector<2x32xf32>
    %344 = arith.addf %341, %343 : vector<2x32xf32>
    %345 = math.tanh %344 : vector<2x32xf32>
    %cst_58 = arith.constant 1.000000e+00 : f32
    %346 = vector.broadcast %cst_58 : f32 to vector<2x32xf32>
    %347 = arith.subf %346, %340 : vector<2x32xf32>
    %348 = arith.mulf %347, %345 : vector<2x32xf32>
    %349 = arith.mulf %340, %305 : vector<2x32xf32>
    %350 = arith.addf %348, %349 : vector<2x32xf32>
    %351 = tpu.concatenate %350, %327 in 1 : vector<2x32xf32>, vector<2x32xf32> -> vector<2x64xf32>
    %cst_59 = arith.constant dense<0.000000e+00> : vector<2x128xf32>
    %352 = tpu.matmul %351, %9, %cst_59 {dimension_numbers = #tpu.dot_dimension_numbers<[1], [0], [0], [1], [0, 0, 1, 1], [], []>} : vector<2x64xf32>, vector<64x128xf32>, vector<2x128xf32> -> vector<2x128xf32>
    %353 = vector.broadcast %10 : vector<1x128xf32> to vector<2x128xf32>
    %354 = arith.addf %352, %353 : vector<2x128xf32>
    %355 = vector.extract_strided_slice %354 {offsets = [0, 0], sizes = [2, 64], strides = [1, 1]} : vector<2x128xf32> to vector<2x64xf32>
    %356 = arith.negf %355 : vector<2x64xf32>
    %357 = math.exp %356 : vector<2x64xf32>
    %cst_60 = arith.constant 1.000000e+00 : f32
    %358 = vector.broadcast %cst_60 : f32 to vector<2x64xf32>
    %359 = arith.addf %358, %357 : vector<2x64xf32>
    %360 = arith.divf %358, %359 : vector<2x64xf32>
    %361 = vector.extract_strided_slice %360 {offsets = [0, 0], sizes = [2, 32], strides = [1, 1]} : vector<2x64xf32> to vector<2x32xf32>
    %362 = vector.extract_strided_slice %360 {offsets = [0, 32], sizes = [2, 32], strides = [1, 1]} : vector<2x64xf32> to vector<2x32xf32>
    %363 = vector.extract_strided_slice %354 {offsets = [0, 64], sizes = [2, 32], strides = [1, 1]} : vector<2x128xf32> to vector<2x32xf32>
    %364 = vector.extract_strided_slice %354 {offsets = [0, 96], sizes = [2, 32], strides = [1, 1]} : vector<2x128xf32> to vector<2x32xf32>
    %365 = arith.mulf %361, %364 : vector<2x32xf32>
    %366 = arith.addf %363, %365 : vector<2x32xf32>
    %367 = math.tanh %366 : vector<2x32xf32>
    %cst_61 = arith.constant 1.000000e+00 : f32
    %368 = vector.broadcast %cst_61 : f32 to vector<2x32xf32>
    %369 = arith.subf %368, %362 : vector<2x32xf32>
    %370 = arith.mulf %369, %367 : vector<2x32xf32>
    %371 = arith.mulf %362, %327 : vector<2x32xf32>
    %372 = arith.addf %370, %371 : vector<2x32xf32>
    %373 = tpu.concatenate %57, %102, %147, %192, %237, %282, %327, %372 in 0 : vector<2x32xf32>, vector<2x32xf32>, vector<2x32xf32>, vector<2x32xf32>, vector<2x32xf32>, vector<2x32xf32>, vector<2x32xf32>, vector<2x32xf32> -> vector<16x32xf32>
    %c3 = arith.constant 3 : index
    %c0_62 = arith.constant 0 : index
    %374 = vector.load %arg4[%c3, %c0_62] : memref<4x128xf32, #tpu.memory_space<vmem>>, vector<1x32xf32>
    %c0_63 = arith.constant 0 : index
    %c0_64 = arith.constant 0 : index
    %375 = vector.load %arg5[%c0_63, %c0_64] : memref<32x32xf32, #tpu.memory_space<vmem>>, vector<32x32xf32>
    %cst_65 = arith.constant dense<0.000000e+00> : vector<16x32xf32>
    %376 = tpu.matmul %373, %375, %cst_65 {dimension_numbers = #tpu.dot_dimension_numbers<[1], [0], [0], [1], [0, 0, 1, 1], [], []>} : vector<16x32xf32>, vector<32x32xf32>, vector<16x32xf32> -> vector<16x32xf32>
    %377 = vector.broadcast %374 : vector<1x32xf32> to vector<16x32xf32>
    %378 = arith.addf %376, %377 : vector<16x32xf32>
    %379 = arith.negf %378 : vector<16x32xf32>
    %380 = math.exp %379 : vector<16x32xf32>
    %cst_66 = arith.constant 1.000000e+00 : f32
    %381 = vector.broadcast %cst_66 : f32 to vector<16x32xf32>
    %382 = arith.addf %381, %380 : vector<16x32xf32>
    %383 = arith.divf %381, %382 : vector<16x32xf32>
    %c0_67 = arith.constant 0 : index
    %c0_68 = arith.constant 0 : index
    %384 = vector.load %arg6[%c0_67, %c0_68] : memref<16x32xf32, #tpu.memory_space<vmem>>, vector<16x32xf32>
    tpu.vector_store %arg6[%c0_67, %c0_68], %383 {strides = array<i32>} : memref<16x32xf32, #tpu.memory_space<vmem>>, vector<16x32xf32>,
    return
  }
}

</mosaic_0001>

<bundles_post_ra>
// kernel: generator_forward.1
= control target key start
LH: loop header
LB: loop body
LE: loop exit
PB: predicated region body
PF: predicated region fallthrough
CT: control target
= control target key end

     0   :  { %11 = vsyncpa [#allocation3], 0  ;;  %s3255_s0 = inlined_call_operand.vmem [shape: f32[16,4], index: 0, kind: input, shape index: {}]   ;;  %s3256_s1 = inlined_call_operand.hbm [shape: f32[4,128], index: 1, kind: input, shape index: {}]   ;;  %s3257_s2 = inlined_call_operand.vmem [shape: f32[32,128], index: 2, kind: input, shape index: {}]   ;;  %s3258_s3 = inlined_call_operand.hbm [shape: f32[1,64,128], index: 3, kind: input, shape index: {}]   ;;  %s3259_s4 = inlined_call_operand.hbm [shape: f32[4,128], index: 4, kind: input, shape index: {}]   ;;  %s3260_s5 = inlined_call_operand.hbm [shape: f32[32,32], index: 5, kind: input, shape index: {}]   ;;  %s3261_s6 = inlined_call_operand.vmem [shape: f32[16,32], index: 6, kind: output, shape index: {}]  }
   0x1   :  { %12 = vsyncpa [#allocation5], 0 }
   0x2   :  { %13 = vsyncpa [#allocation8], 0  ;;  %s2797_s21 = smov [#allocation4]   ;;  %s2703_s25 = scalar_lea.hbm %s3258_s3, 1024 }
   0x3   :  { %s33_s22 = sshll.u32 %s2797_s21, 4  ;;  %p2704_p0 = scmp.ne.s32.totalorder %s3258_s3, %s2703_s25  ;;  %s34_s22 = int_to_ptr.vmem [resolvable:$true] %s33_s22 }
   0x4   :  { %p2707_p1 = scmp.lt.u32.totalorder %s2703_s25, %s3258_s3 }
   0x6   :  { %p2709_p2 = pnand %p2707_p1, %p2704_p0 }
   0x8   :  { %2712 = shalt.err (!%p2709_p2)
}
   0x9   :  { %s2713_s30 = scalar_lea.vmem %s34_s22, 1024  ;;  %p2718_p4 = scmp.lt.s32.totalorder %s34_s22, %s34_s22 }
   0xa   :  { %p2714_p3 = scmp.ne.s32.totalorder %s34_s22, %s2713_s30  ;;  %p2719_p5 = scmp.lt.s32.totalorder %s2713_s30, %s2713_s30 }
   0xc   :  { %p2720_p6 = por %p2719_p5, %p2718_p4 }
   0xe   :  { %p2721_p7 = pnand %p2720_p6, %p2714_p3 }
  0x10   :  { %2724 = shalt.err (!%p2721_p7)
}
  0x11   :  { %s2798_s7 = smov 128   ;;  %s2799_s8 = smov 8  }
  0x12   :  { %39 = dma.hbm_to_vmem [thread:$0]  %s3258_s3, 1024, %s34_s22, [#allocation5], %s2798_s7, %s2798_s7, %s2799_s8  }
  0x13   :  { %s2800_s11 = smov [#allocation2]   ;;  %s2801_s13 = smov [#allocation6]  }
  0x14   :  { %s22_s12 = sshll.u32 %s2800_s11, 4  ;;  %s46_s14 = sshll.u32 %s2801_s13, 4  ;;  %s23_s12 = int_to_ptr.vmem [resolvable:$true] %s22_s12  ;;  %s47_s14 = int_to_ptr.vmem [resolvable:$true] %s46_s14 }
  0x15   :  { %s2725_s17 = scalar_lea.hbm %s3256_s1, 64 }
  0x16   :  { %p2726_p8 = scmp.ne.s32.totalorder %s3256_s1, %s2725_s17  ;;  %p2729_p9 = scmp.lt.u32.totalorder %s2725_s17, %s3256_s1 }
  0x18   :  { %p2731_p10 = pnand %p2729_p9, %p2726_p8 }
  0x1a   :  { %2734 = shalt.err (!%p2731_p10)
}
  0x1b   :  { %s2735_s3 = scalar_lea.vmem %s23_s12, 64  ;;  %p2740_p12 = scmp.lt.s32.totalorder %s23_s12, %s23_s12 }
  0x1c   :  { %p2736_p11 = scmp.ne.s32.totalorder %s23_s12, %s2735_s3  ;;  %p2741_p13 = scmp.lt.s32.totalorder %s2735_s3, %s2735_s3 }
  0x1e   :  { %p2742_p0 = por %p2741_p13, %p2740_p12 }
  0x20   :  { %p2743_p1 = pnand %p2742_p0, %p2736_p11 }
  0x22   :  { %2746 = shalt.err (!%p2743_p1)
}
  0x23   :  { %25 = dma.hbm_to_vmem [thread:$0]  %s3256_s1, 64, %s23_s12, [#allocation3]  }
  0x24   :  { %s2747_s26 = scalar_lea.hbm %s3259_s4, 64 }
  0x25   :  { %p2748_p2 = scmp.ne.s32.totalorder %s3259_s4, %s2747_s26  ;;  %p2751_p3 = scmp.lt.u32.totalorder %s2747_s26, %s3259_s4 }
  0x27   :  { %p2753_p4 = pnand %p2751_p3, %p2748_p2 }
  0x29   :  { %2756 = shalt.err (!%p2753_p4)
}
  0x2a   :  { %s2757_s9 = scalar_lea.vmem %s47_s14, 64  ;;  %p2762_p6 = scmp.lt.s32.totalorder %s47_s14, %s47_s14 }
  0x2b   :  { %p2758_p5 = scmp.ne.s32.totalorder %s47_s14, %s2757_s9  ;;  %p2763_p7 = scmp.lt.s32.totalorder %s2757_s9, %s2757_s9 }
  0x2d   :  { %p2764_p8 = por %p2763_p7, %p2762_p6 }
  0x2f   :  { %p2765_p9 = pnand %p2764_p8, %p2758_p5 }
  0x31   :  { %2768 = shalt.err (!%p2765_p9)
}
  0x32   :  { %49 = dma.hbm_to_vmem [thread:$0]  %s3259_s4, 64, %s47_s14, [#allocation5]  }
  0x33   :  { %s2802_s11 = smov [#allocation7]   ;;  %s2769_s16 = scalar_lea.hbm %s3260_s5, 512 }
  0x34   :  { %s55_s12 = sshll.u32 %s2802_s11, 4  ;;  %p2770_p10 = scmp.ne.s32.totalorder %s3260_s5, %s2769_s16  ;;  %s56_s12 = int_to_ptr.vmem [resolvable:$true] %s55_s12 }
  0x35   :  { %p2773_p11 = scmp.lt.u32.totalorder %s2769_s16, %s3260_s5 }
  0x37   :  { %p2775_p12 = pnand %p2773_p11, %p2770_p10 }
  0x39   :  { %2778 = shalt.err (!%p2775_p12)
}
  0x3a   :  { %s2779_s21 = scalar_lea.vmem %s56_s12, 512  ;;  %p2784_p0 = scmp.lt.s32.totalorder %s56_s12, %s56_s12 }
  0x3b   :  { %p2780_p13 = scmp.ne.s32.totalorder %s56_s12, %s2779_s21  ;;  %p2785_p1 = scmp.lt.s32.totalorder %s2779_s21, %s2779_s21 }
  0x3d   :  { %p2786_p2 = por %p2785_p1, %p2784_p0 }
  0x3f   :  { %p2787_p3 = pnand %p2786_p2, %p2780_p13 }
  0x41   :  { %2790 = shalt.err (!%p2787_p3)
}
  0x42   :  { %61 = dma.hbm_to_vmem [thread:$0]  %s3260_s5, 512, %s56_s12, [#allocation8], %s2798_s7, %s2798_s7, %s2799_s8  }
  0x43   :  { %2791 = dma.done.wait [#allocation3], 64  }
  0x44   :  { %2792 = vsyncadd [#allocation3], 4294967232 }
  0x45   :  { %2793 = dma.done.wait [#allocation5], 1088  }
  0x46   :  { %2794 = vsyncadd [#allocation5], 4294966208 }
  0x47   :  { %2795 = dma.done.wait [#allocation8], 512  }
  0x48   :  { %2796 = vsyncadd [#allocation8], 4294966784  ;;  %v2803_v0 = vmov 0.0|0.0   ;;  %vm2804_vm0 = vmmov 0   ;;  %v2805_v1 = vmov 0.0   ;;  %vm89_vm1 = vcmask 1043456  }
  0x49   :  { %2435 = vmatprep.subr.bf16.mxu1 %v2803_v0  ;;  %2192 = vmatprep.mubr.msk.f32.mxu1 %vm2804_vm0, %v2805_v1  ;;  %vm82_vm2 = vcmask 31744   ;;  %v168_v2 = vld [vmem:[%s3257_s2] sm:$0xff]  ;;  %v169_v3 = vld [vmem:[%s3257_s2 + $0x8] sm:$0xff]  ;;  %v170_v8 = vld [vmem:[%s3257_s2 + $0x10] sm:$0xff]  ;;  %s2808_s30 = smov 96   ;;  %vm182_vm3 = vcmask 261120  }
  0x4a   :  { %v77_v4 = vld [vmem:[#allocation2] sm:$0xf]  ;;  %v2907_v5 = vpack.c.bf16 %v169_v3, %v168_v2  ;;  %v76_v7 = vld [vmem:[%s3255_s0 + $0x8] sm:$0xff]  ;;  %v171_v9 = vld [vmem:[%s3257_s2 + $0x18] sm:$0xff]  ;;  %s2807_s2 = smov 64   ;;  %vm296_vm4 = vcmask 523264  }
  0x4b   :  { %2179 = vmatprep.subr.msk.mxu0 %vm89_vm1, %v77_v4  ;;  %v75_v6 = vld [vmem:[%s3255_s0] sm:$0xff]  ;;  %v2924_v10 = vpack.c.bf16 %v171_v9, %v170_v8  ;;  %s2806_s0 = smov 32   ;;  %v174_v30 = vld [vmem:[#allocation4 + $0x8] sm:$0xff]  ;;  %v175_v31 = vld [vmem:[#allocation4 + $0x10] sm:$0xff]  ;;  %vm1893_vm5 = vcmask 1041408   ;;  %vm1896_vm6 = vcmask 1045504  }
  0x4c   :  { %2180 = vmatpush3.msk.msra.mxu0 %vm89_vm1, %v77_v4  ;;  %2181 = vmatprep.mubr.msk.f32.mxu0 %vm82_vm2, %v75_v6  ;;  %v2016_v11 = vld [vmem:[#allocation6] ss:$0 sm:$0xff]  ;;  %v2943_v16 = vld [vmem:[#allocation6 + $0x1] ss:$0 sm:$0xff]  ;;  %v176_v33 = vld [vmem:[#allocation4 + $0x18] sm:$0xff] }
  0x4d   :  { %2437 = vmatpush3.bf16.msra.mxu1 %v2907_v5  ;;  %2182 = vmatmul.mubr.msk.f32.vlgmr.msra.gmra.mrb[0].mxu0 %vm82_vm2, %v76_v7  ;;  %v173_v29 = vld [vmem:[#allocation4] sm:$0xff]  ;;  %v2952_v34 = vpack.c.bf16 %v176_v33, %v175_v31  ;;  %v178_v36 = vld [vmem:[#allocation4 + $0x28] sm:$0xff]  ;;  %v179_v39 = vld [vmem:[#allocation4 + $0x30] sm:$0xff] }
  0x4e   :  { %2438 = vmatprep.subr.bf16.mxu1 %v2803_v0  ;;  %2441 = vmatprep.subr.bf16.mxu0 %v2803_v0  ;;  %v2949_v32 = vpack.c.bf16 %v174_v30, %v173_v29  ;;  %v177_v35 = vld [vmem:[#allocation4 + $0x20] sm:$0xff]  ;;  %v180_v40 = vld [vmem:[#allocation4 + $0x38] sm:$0xff] }
  0x4f   :  { %2211 = vmatprep.mubr.msk.f32.mxu0 %vm2804_vm0, %v2805_v1  ;;  %v2956_v37 = vpack.c.bf16 %v178_v36, %v177_v35  ;;  %v2961_v41 = vpack.c.bf16 %v180_v40, %v179_v39  ;;  %v2990_v3 = vld [vmem:[#allocation6 + $0x2] ss:$0 sm:$0xff] }
  0x50   :  { %2443 = vmatpush3.bf16.msra.mxu0 %v2949_v32 }
  0x51   :  { %2440 = vmatpush3.bf16.msra.mxu1 %v2924_v10  ;;  %2444 = vmatprep.subr.bf16.mxu0 %v2803_v0 }
  0x52   :  { %2453 = vmatprep.subr.bf16.mxu1 %v2803_v0 }
  0x54   :  { %2193 = vmatmul.mubr.f32.vlgmr.msra.gmra.mrb[0].mxu1 %v2805_v1  ;;  %2446 = vmatpush3.bf16.msra.mxu0 %v2952_v34 }
  0x55   :  { %2455 = vmatpush3.bf16.msra.mxu1 %v2907_v5  ;;  %2222 = vmatprep.mubr.msk.f32.mxu1 %vm2804_vm0, %v2805_v1 }
  0x56   :  { %2456 = vmatprep.subr.bf16.mxu1 %v2803_v0  ;;  %2447 = vmatprep.subr.bf16.mxu0 %v2803_v0 }
  0x58   :  { %2449 = vmatpush3.bf16.msra.mxu0 %v2956_v37 }
  0x59   :  { %2458 = vmatpush3.bf16.msra.mxu1 %v2924_v10  ;;  %2450 = vmatprep.subr.bf16.mxu0 %v2803_v0 }
  0x5a   :  { %2459 = vmatprep.subr.bf16.mxu1 %v2803_v0 }
  0x5c   :  { %2452 = vmatpush3.bf16.msra.mxu0 %v2961_v41 }
  0x5d   :  { %2471 = vmatprep.subr.bf16.mxu0 %v2803_v0 }
 0x120   :  { %v2183_v12 = vpop.f32.mrb[0].mxu0 }
 0x121   :  { %v2939_v13 = vadd.f32 %v2183_v12, %v2016_v11  ;;  %v159_v14 = vpop.f32.mrb[1].mxu0 }
 0x122   :  { %v2941_v15 = vadd.f32 %v2016_v11, %v159_v14 }
 0x127   :  { %v252_v17 = vpop.f32.mrb[0].mxu1 }
 0x128   :  { %v256_v18 = vadd.f32 %v252_v17, %v2941_v15  ;;  %v2194_v19 = vpop.f32.mrb[1].mxu1 }
 0x12a   :  { %v261_v20 = vadd.f32 %v2943_v16, %v256_v18 }
 0x12c   :  { %269 = vrot.lane.b32.xlu0 %v261_v20, %s2806_s0  ;;  %v2021_v21 = vmul.f32 -1.442695, %v261_v20 }
 0x12e   :  { %2599 = vpow2.f32 %v2021_v21 }
 0x138   :  { %v2600_v22 = vpop.eup %2599 }
 0x139   :  { %v265_v23 = vadd.f32 1.0, %v2600_v22 }
 0x13b   :  { %2601 = vrcp.f32 %v265_v23 }
 0x145   :  { %v2602_v24 = vpop.eup %2601 }
 0x146   :  { %v279_v42 = vsub.f32 1.0, %v2602_v24  ;;  %v285_v44 = vmul.f32 0.0, %v2602_v24 }
 0x19e   :  { %v270_v25 = vpop.permute.xlu0 %269 }
 0x19f   :  { %v272_v26 = vmul.f32 %v2602_v24, %v270_v25 }
 0x1a1   :  { %274 = vrot.lane.b32.xlu0 %v272_v26, %s2807_s2 }
 0x213   :  { %v275_v27 = vpop.permute.xlu0 %274 }
 0x214   :  { %v277_v28 = vadd.f32 %v275_v27, %v261_v20 }
 0x216   :  { %2603 = vtanh.f32 %v277_v28 }
 0x220   :  { %v2604_v38 = vpop.eup %2603 }
 0x221   :  { %281 = vrot.lane.b32.xlu1 %v2604_v38, %s2808_s30 }
 0x293   :  { %v282_v43 = vpop.permute.xlu1 %281 }
 0x294   :  { %v284_v45 = vmul.f32 %v282_v43, %v279_v42 }
 0x296   :  { %v286_v46 = vadd.f32 %v285_v44, %v284_v45 }
 0x298   :  { %288 = vrot.lane.b32.xlu1 %v286_v46, %s2808_s30  ;;  %v495_v9 = vrot.slane %v286_v46, 6 }
 0x30a   :  { %v289_v47 = vpop.permute.xlu1 %288 }
 0x30b   :  { %v291_v48 = vsel %vm182_vm3, %v289_v47, 0.0  ;;  %2223 = vmatmul.mubr.msk.f32.vlgmr.msra.gmra.mrb[2].mxu1 %vm182_vm3, %v289_v47 }
 0x30c   :  { %2212 = vmatmul.mubr.msk.f32.vlgmr.msra.gmra.mrb[2].mxu0 %vm296_vm4, %v291_v48  ;;  %2461 = vmatpush3.bf16.msra.mxu1 %v2949_v32 }
 0x30d   :  { %2473 = vmatpush3.bf16.msra.mxu0 %v2907_v5  ;;  %2252 = vmatprep.mubr.msk.f32.mxu0 %vm2804_vm0, %v2805_v1 }
 0x30e   :  { %2474 = vmatprep.subr.bf16.mxu0 %v2803_v0  ;;  %2462 = vmatprep.subr.bf16.mxu1 %v2803_v0 }
 0x30f   :  { %2241 = vmatprep.mubr.msk.f32.mxu1 %vm2804_vm0, %v2805_v1 }
 0x310   :  { %2464 = vmatpush3.bf16.msra.mxu1 %v2952_v34 }
 0x311   :  { %2476 = vmatpush3.bf16.msra.mxu0 %v2924_v10  ;;  %2465 = vmatprep.subr.bf16.mxu1 %v2803_v0 }
 0x312   :  { %2477 = vmatprep.subr.bf16.mxu0 %v2803_v0 }
 0x314   :  { %2467 = vmatpush3.bf16.msra.mxu1 %v2956_v37 }
 0x315   :  { %2468 = vmatprep.subr.bf16.mxu1 %v2803_v0 }
 0x318   :  { %2470 = vmatpush3.bf16.msra.mxu1 %v2961_v41 }
 0x319   :  { %2489 = vmatprep.subr.bf16.mxu1 %v2803_v0 }
 0x3de   :  { %v463_v49 = vpop.f32.mrb[2].mxu1 }
 0x3df   :  { %v468_v50 = vrot.slane %v463_v49, 6  ;;  %v366_v51 = vpop.f32.mrb[2].mxu0  ;;  %v2224_v52 = vpop.f32.mrb[3].mxu1 }
 0x3e0   :  { %v2213_v53 = vpop.f32.mrb[3].mxu0  ;;  %v367_v4 = vadd.f32 %v2990_v3, %v366_v51 }
 0x3e1   :  { %v470_v54 = vadd.f32 %v468_v50, %v2941_v15 }
 0x3e2   :  { %v2024_v6 = vmul.f32 -1.442695, %v367_v4 }
 0x3e3   :  { %v471_v55 = vadd.f32 %v2943_v16, %v470_v54 }
 0x3e5   :  { %479 = vrot.lane.b32.xlu0 %v471_v55, %s2806_s0  ;;  %v2026_v56 = vmul.f32 -1.442695, %v471_v55 }
 0x3e7   :  { %2605 = vpow2.f32 %v2026_v56 }
 0x3f1   :  { %v2606_v57 = vpop.eup %2605 }
 0x3f2   :  { %v475_v58 = vadd.f32 1.0, %v2606_v57 }
 0x3f4   :  { %2607 = vrcp.f32 %v475_v58 }
 0x3fe   :  { %v2608_v59 = vpop.eup %2607 }
 0x3ff   :  { %v489_v11 = vsub.f32 1.0, %v2608_v59  ;;  %v497_v17 = vmul.f32 %v2608_v59, %v495_v9 }
 0x457   :  { %v480_v60 = vpop.permute.xlu0 %479 }
 0x458   :  { %v482_v61 = vmul.f32 %v2608_v59, %v480_v60 }
 0x45a   :  { %484 = vrot.lane.b32.xlu1 %v482_v61, %s2807_s2 }
 0x4cc   :  { %v485_v62 = vpop.permute.xlu1 %484 }
 0x4cd   :  { %v487_v63 = vadd.f32 %v485_v62, %v471_v55 }
 0x4cf   :  { %2609 = vtanh.f32 %v487_v63 }
 0x4d0   :  { %2611 = vpow2.f32 %v2024_v6 }
 0x4d9   :  { %v2610_v2 = vpop.eup %2609 }
 0x4da   :  { %491 = vrot.lane.b32.xlu0 %v2610_v2, %s2808_s30  ;;  %v2612_v7 = vpop.eup %2611 }
 0x4db   :  { %v373_v8 = vadd.f32 1.0, %v2612_v7 }
 0x4dd   :  { %2613 = vrcp.f32 %v373_v8 }
 0x4de   :  { %377 = vrot.lane.b32.xlu0 %v367_v4, %s2806_s0 }
 0x4e7   :  { %v2614_v21 = vpop.eup %2613 }
 0x4e8   :  { %v387_v43 = vsub.f32 1.0, %v2614_v21  ;;  %v393_v45 = vmul.f32 0.0, %v2614_v21 }
 0x54c   :  { %v492_v12 = vpop.permute.xlu0 %491 }
 0x54d   :  { %v494_v14 = vmul.f32 %v492_v12, %v489_v11 }
 0x54f   :  { %v2995_v18 = vadd.f32 %v497_v17, %v494_v14 }
 0x550   :  { %v378_v20 = vpop.permute.xlu0 %377 }
 0x551   :  { %v606_v19 = vrot.slane %v2995_v18, 2  ;;  %v380_v22 = vmul.f32 %v2614_v21, %v378_v20  ;;  %v709_v55 = vrot.slane %v2995_v18, 6 }
 0x553   :  { %607 = vrot.lane.b32.xlu1 %v606_v19, %s2808_s30 }
 0x557   :  { %382 = vrot.lane.b32.xlu1 %v380_v22, %s2807_s2 }
 0x5c5   :  { %v608_v23 = vpop.permute.xlu1 %607 }
 0x5c6   :  { %2253 = vmatmul.mubr.msk.f32.vlgmr.msra.gmra.mrb[4].mxu0 %vm182_vm3, %v608_v23 }
 0x5c7   :  { %2479 = vmatpush3.bf16.msra.mxu0 %v2949_v32  ;;  %2271 = vmatprep.mubr.msk.f32.mxu0 %vm2804_vm0, %v2805_v1 }
 0x5c8   :  { %2480 = vmatprep.subr.bf16.mxu0 %v2803_v0 }
 0x5c9   :  { %v383_v24 = vpop.permute.xlu1 %382 }
 0x5ca   :  { %v385_v25 = vadd.f32 %v383_v24, %v367_v4 }
 0x5cb   :  { %2482 = vmatpush3.bf16.msra.mxu0 %v2952_v34 }
 0x5cc   :  { %2483 = vmatprep.subr.bf16.mxu0 %v2803_v0  ;;  %2615 = vtanh.f32 %v385_v25 }
 0x5cf   :  { %2485 = vmatpush3.bf16.msra.mxu0 %v2956_v37 }
 0x5d0   :  { %2486 = vmatprep.subr.bf16.mxu0 %v2803_v0 }
 0x5d3   :  { %2488 = vmatpush3.bf16.msra.mxu0 %v2961_v41 }
 0x5d4   :  { %2507 = vmatprep.subr.bf16.mxu0 %v2803_v0 }
 0x5d6   :  { %v2616_v31 = vpop.eup %2615 }
 0x699   :  { %v677_v26 = vpop.f32.mrb[4].mxu0 }
 0x69a   :  { %v682_v27 = vrot.slane %v677_v26, 4  ;;  %v2254_v28 = vpop.f32.mrb[5].mxu0 }
 0x69c   :  { %v684_v29 = vadd.f32 %v682_v27, %v2941_v15 }
 0x69e   :  { %v685_v30 = vadd.f32 %v2943_v16, %v684_v29 }
 0x6a0   :  { %693 = vrot.lane.b32.xlu0 %v685_v30, %s2806_s0  ;;  %v2030_v33 = vmul.f32 -1.442695, %v685_v30 }
 0x6a2   :  { %2617 = vpow2.f32 %v2030_v33 }
 0x6a4   :  { %389 = vrot.lane.b32.xlu0 %v2616_v31, %s2808_s30 }
 0x6ac   :  { %v2618_v35 = vpop.eup %2617 }
 0x6ad   :  { %v689_v36 = vadd.f32 1.0, %v2618_v35 }
 0x6af   :  { %2619 = vrcp.f32 %v689_v36 }
 0x6b9   :  { %v2620_v38 = vpop.eup %2619 }
 0x6ba   :  { %v703_v54 = vsub.f32 1.0, %v2620_v38  ;;  %v711_v57 = vmul.f32 %v2620_v38, %v709_v55 }
 0x712   :  { %v694_v39 = vpop.permute.xlu0 %693 }
 0x713   :  { %v696_v40 = vmul.f32 %v2620_v38, %v694_v39 }
 0x715   :  { %698 = vrot.lane.b32.xlu1 %v696_v40, %s2807_s2 }
 0x716   :  { %v390_v42 = vpop.permute.xlu0 %389 }
 0x717   :  { %v392_v44 = vmul.f32 %v390_v42, %v387_v43 }
 0x719   :  { %500 = vrot.lane.b32.xlu1 %v2995_v18, %s2808_s30  ;;  %v3018_v46 = vadd.f32 %v393_v45, %v392_v44 }
 0x71b   :  { %v504_v49 = vrot.slane %v3018_v46, 6 }
 0x787   :  { %v699_v47 = vpop.permute.xlu1 %698 }
 0x788   :  { %v701_v48 = vadd.f32 %v699_v47, %v685_v30 }
 0x78a   :  { %2621 = vtanh.f32 %v701_v48 }
 0x78b   :  { %v501_v50 = vpop.permute.xlu1 %500 }
 0x78c   :  { %v506_v51 = vsel %vm182_vm3, %v501_v50, %v504_v49 }
 0x78d   :  { %v508_v52 = vrot.slane %v506_v51, 2 }
 0x78f   :  { %2242 = vmatmul.mubr.msk.f32.vlgmr.msra.gmra.mrb[4].mxu1 %vm296_vm4, %v508_v52 }
 0x790   :  { %2491 = vmatpush3.bf16.msra.mxu1 %v2907_v5  ;;  %2282 = vmatprep.mubr.msk.f32.mxu1 %vm2804_vm0, %v2805_v1 }
 0x791   :  { %2492 = vmatprep.subr.bf16.mxu1 %v2803_v0 }
 0x794   :  { %v2622_v53 = vpop.eup %2621  ;;  %2494 = vmatpush3.bf16.msra.mxu1 %v2924_v10 }
 0x795   :  { %705 = vrot.lane.b32.xlu0 %v2622_v53, %s2808_s30  ;;  %2495 = vmatprep.subr.bf16.mxu1 %v2803_v0 }
 0x807   :  { %v706_v56 = vpop.permute.xlu0 %705 }
 0x808   :  { %v708_v58 = vmul.f32 %v706_v56, %v703_v54 }
 0x80a   :  { %v3031_v59 = vadd.f32 %v711_v57, %v708_v58 }
 0x80c   :  { %v820_v60 = vrot.slane %v3031_v59, 4  ;;  %v923_v49 = vrot.slane %v3031_v59, 6 }
 0x80e   :  { %821 = vrot.lane.b32.xlu1 %v820_v60, %s2808_s30 }
 0x862   :  { %v577_v61 = vpop.f32.mrb[4].mxu1 }
 0x863   :  { %v578_v62 = vadd.f32 %v2990_v3, %v577_v61  ;;  %v2243_v63 = vpop.f32.mrb[5].mxu1 }
 0x865   :  { %588 = vrot.lane.b32.xlu0 %v578_v62, %s2806_s0  ;;  %v2028_v4 = vmul.f32 -1.442695, %v578_v62 }
 0x867   :  { %2623 = vpow2.f32 %v2028_v4 }
 0x871   :  { %v2624_v6 = vpop.eup %2623 }
 0x872   :  { %v584_v7 = vadd.f32 1.0, %v2624_v6 }
 0x874   :  { %2625 = vrcp.f32 %v584_v7 }
 0x87e   :  { %v2626_v8 = vpop.eup %2625 }
 0x87f   :  { %v598_v26 = vsub.f32 1.0, %v2626_v8 }
 0x880   :  { %v822_v2 = vpop.permute.xlu1 %821 }
 0x881   :  { %2283 = vmatmul.mubr.msk.f32.vlgmr.msra.gmra.mrb[6].mxu1 %vm182_vm3, %v822_v2 }
 0x882   :  { %2497 = vmatpush3.bf16.msra.mxu1 %v2949_v32  ;;  %2301 = vmatprep.mubr.msk.f32.mxu1 %vm2804_vm0, %v2805_v1 }
 0x883   :  { %2498 = vmatprep.subr.bf16.mxu1 %v2803_v0 }
 0x886   :  { %2500 = vmatpush3.bf16.msra.mxu1 %v2952_v34 }
 0x887   :  { %2501 = vmatprep.subr.bf16.mxu1 %v2803_v0 }
 0x88a   :  { %2503 = vmatpush3.bf16.msra.mxu1 %v2956_v37 }
 0x88b   :  { %2504 = vmatprep.subr.bf16.mxu1 %v2803_v0 }
 0x88e   :  { %2506 = vmatpush3.bf16.msra.mxu1 %v2961_v41 }
 0x88f   :  { %2525 = vmatprep.subr.bf16.mxu1 %v2803_v0 }
 0x8d7   :  { %v589_v9 = vpop.permute.xlu0 %588 }
 0x8d8   :  { %v591_v11 = vmul.f32 %v2626_v8, %v589_v9 }
 0x8da   :  { %593 = vrot.lane.b32.xlu1 %v591_v11, %s2807_s2 }
 0x94c   :  { %v594_v12 = vpop.permute.xlu1 %593 }
 0x94d   :  { %v596_v14 = vadd.f32 %v594_v12, %v578_v62 }
 0x94f   :  { %2627 = vtanh.f32 %v596_v14 }
 0x954   :  { %v891_v17 = vpop.f32.mrb[6].mxu1 }
 0x955   :  { %v896_v18 = vrot.slane %v891_v17, 2  ;;  %v2284_v19 = vpop.f32.mrb[7].mxu1 }
 0x957   :  { %v898_v20 = vadd.f32 %v896_v18, %v2941_v15  ;;  %v604_v15 = vmul.f32 %v2626_v8, %v3018_v46 }
 0x959   :  { %v2628_v21 = vpop.eup %2627  ;;  %v899_v22 = vadd.f32 %v2943_v16, %v898_v20 }
 0x95a   :  { %600 = vrot.lane.b32.xlu1 %v2628_v21, %s2808_s30 }
 0x95b   :  { %907 = vrot.lane.b32.xlu0 %v899_v22, %s2806_s0  ;;  %v2034_v23 = vmul.f32 -1.442695, %v899_v22 }
 0x95d   :  { %2629 = vpow2.f32 %v2034_v23 }
 0x95f   :  { %714 = vrot.lane.b32.xlu0 %v3031_v59, %s2808_s30 }
 0x967   :  { %v2630_v24 = vpop.eup %2629 }
 0x968   :  { %v903_v25 = vadd.f32 1.0, %v2630_v24 }
 0x96a   :  { %2631 = vrcp.f32 %v903_v25 }
 0x974   :  { %v2632_v28 = vpop.eup %2631 }
 0x975   :  { %v917_v48 = vsub.f32 1.0, %v2632_v28  ;;  %v925_v51 = vmul.f32 %v2632_v28, %v923_v49 }
 0x9cc   :  { %v601_v27 = vpop.permute.xlu1 %600 }
 0x9cd   :  { %v603_v29 = vmul.f32 %v601_v27, %v598_v26  ;;  %v908_v30 = vpop.permute.xlu0 %907 }
 0x9ce   :  { %v910_v31 = vmul.f32 %v2632_v28, %v908_v30 }
 0x9cf   :  { %v3056_v33 = vadd.f32 %v604_v15, %v603_v29 }
 0x9d0   :  { %912 = vrot.lane.b32.xlu1 %v910_v31, %s2807_s2 }
 0x9d1   :  { %v715_v35 = vpop.permute.xlu0 %714  ;;  %v718_v36 = vrot.slane %v3056_v33, 4 }
 0x9d3   :  { %v720_v38 = vsel %vm182_vm3, %v715_v35, %v718_v36 }
 0x9d4   :  { %v722_v39 = vrot.slane %v720_v38, 4 }
 0x9d6   :  { %2272 = vmatmul.mubr.msk.f32.vlgmr.msra.gmra.mrb[6].mxu0 %vm296_vm4, %v722_v39 }
 0x9d7   :  { %2509 = vmatpush3.bf16.msra.mxu0 %v2907_v5  ;;  %2312 = vmatprep.mubr.msk.f32.mxu0 %vm2804_vm0, %v2805_v1 }
 0x9d8   :  { %2510 = vmatprep.subr.bf16.mxu0 %v2803_v0 }
 0x9db   :  { %2512 = vmatpush3.bf16.msra.mxu0 %v2924_v10 }
 0x9dc   :  { %2513 = vmatprep.subr.bf16.mxu0 %v2803_v0 }
 0xa42   :  { %v913_v40 = vpop.permute.xlu1 %912 }
 0xa43   :  { %v915_v42 = vadd.f32 %v913_v40, %v899_v22 }
 0xa45   :  { %2633 = vtanh.f32 %v915_v42 }
 0xa4f   :  { %v2634_v43 = vpop.eup %2633 }
 0xa50   :  { %919 = vrot.lane.b32.xlu0 %v2634_v43, %s2808_s30 }
 0xaa9   :  { %v791_v44 = vpop.f32.mrb[6].mxu0 }
 0xaaa   :  { %v792_v45 = vadd.f32 %v2990_v3, %v791_v44  ;;  %v2273_v47 = vpop.f32.mrb[7].mxu0 }
 0xaac   :  { %802 = vrot.lane.b32.xlu0 %v792_v45, %s2806_s0  ;;  %v2032_v55 = vmul.f32 -1.442695, %v792_v45 }
 0xaae   :  { %2635 = vpow2.f32 %v2032_v55 }
 0xab8   :  { %v2636_v56 = vpop.eup %2635 }
 0xab9   :  { %v798_v57 = vadd.f32 1.0, %v2636_v56 }
 0xabb   :  { %2637 = vrcp.f32 %v798_v57 }
 0xac2   :  { %v920_v50 = vpop.permute.xlu0 %919 }
 0xac3   :  { %v922_v52 = vmul.f32 %v920_v50, %v917_v48 }
 0xac5   :  { %v3072_v53 = vadd.f32 %v925_v51, %v922_v52  ;;  %v2638_v58 = vpop.eup %2637 }
 0xac6   :  { %v812_v9 = vsub.f32 1.0, %v2638_v58  ;;  %v818_v12 = vmul.f32 %v2638_v58, %v3056_v33 }
 0xac7   :  { %v1034_v54 = vrot.slane %v3072_v53, 6 }
 0xac9   :  { %1035 = vrot.lane.b32.xlu1 %v1034_v54, %s2808_s30 }
 0xb1e   :  { %v803_v60 = vpop.permute.xlu0 %802 }
 0xb1f   :  { %v805_v61 = vmul.f32 %v2638_v58, %v803_v60 }
 0xb21   :  { %807 = vrot.lane.b32.xlu1 %v805_v61, %s2807_s2 }
 0xb25   :  { %928 = vrot.lane.b32.xlu1 %v3072_v53, %s2808_s30 }
 0xb3b   :  { %v1036_v59 = vpop.permute.xlu1 %1035 }
 0xb3c   :  { %2313 = vmatmul.mubr.msk.f32.vlgmr.msra.gmra.mrb[8].mxu0 %vm182_vm3, %v1036_v59 }
 0xb3d   :  { %2515 = vmatpush3.bf16.msra.mxu0 %v2949_v32  ;;  %2331 = vmatprep.mubr.msk.f32.mxu0 %vm2804_vm0, %v2805_v1 }
 0xb3e   :  { %2516 = vmatprep.subr.bf16.mxu0 %v2803_v0 }
 0xb41   :  { %2518 = vmatpush3.bf16.msra.mxu0 %v2952_v34 }
 0xb42   :  { %2519 = vmatprep.subr.bf16.mxu0 %v2803_v0 }
 0xb45   :  { %2521 = vmatpush3.bf16.msra.mxu0 %v2956_v37 }
 0xb46   :  { %2522 = vmatprep.subr.bf16.mxu0 %v2803_v0 }
 0xb49   :  { %2524 = vmatpush3.bf16.msra.mxu0 %v2961_v41 }
 0xb4a   :  { %2543 = vmatprep.subr.bf16.mxu0 %v2803_v0 }
 0xb93   :  { %v808_v62 = vpop.permute.xlu1 %807 }
 0xb94   :  { %v810_v63 = vadd.f32 %v808_v62, %v792_v45 }
 0xb96   :  { %2639 = vtanh.f32 %v810_v63 }
 0xb97   :  { %v929_v19 = vpop.permute.xlu1 %928 }
 0xba0   :  { %v2640_v2 = vpop.eup %2639 }
 0xba1   :  { %814 = vrot.lane.b32.xlu0 %v2640_v2, %s2808_s30 }
 0xc0f   :  { %v1105_v4 = vpop.f32.mrb[8].mxu0 }
 0xc10   :  { %v1109_v6 = vadd.f32 %v1105_v4, %v2939_v13  ;;  %v2314_v7 = vpop.f32.mrb[9].mxu0 }
 0xc12   :  { %v1110_v8 = vadd.f32 %v2943_v16, %v1109_v6 }
 0xc13   :  { %v815_v11 = vpop.permute.xlu0 %814 }
 0xc14   :  { %v817_v14 = vmul.f32 %v815_v11, %v812_v9  ;;  %1118 = vrot.lane.b32.xlu0 %v1110_v8, %s2806_s0  ;;  %v2038_v22 = vmul.f32 -1.442695, %v1110_v8 }
 0xc16   :  { %v3097_v17 = vadd.f32 %v818_v12, %v817_v14  ;;  %2641 = vpow2.f32 %v2038_v22 }
 0xc18   :  { %v932_v18 = vrot.slane %v3097_v17, 2 }
 0xc1a   :  { %v934_v20 = vsel %vm182_vm3, %v929_v19, %v932_v18 }
 0xc1b   :  { %v936_v21 = vrot.slane %v934_v20, 6 }
 0xc1d   :  { %2302 = vmatmul.mubr.msk.f32.vlgmr.msra.gmra.mrb[8].mxu1 %vm296_vm4, %v936_v21 }
 0xc1e   :  { %2527 = vmatpush3.bf16.msra.mxu1 %v2907_v5  ;;  %2342 = vmatprep.mubr.msk.f32.mxu1 %vm2804_vm0, %v2805_v1 }
 0xc1f   :  { %2528 = vmatprep.subr.bf16.mxu1 %v2803_v0 }
 0xc20   :  { %v2642_v23 = vpop.eup %2641 }
 0xc21   :  { %v1114_v24 = vadd.f32 1.0, %v2642_v23 }
 0xc22   :  { %2530 = vmatpush3.bf16.msra.mxu1 %v2924_v10 }
 0xc23   :  { %2531 = vmatprep.subr.bf16.mxu1 %v2803_v0  ;;  %2643 = vrcp.f32 %v1114_v24 }
 0xc2d   :  { %v2644_v25 = vpop.eup %2643 }
 0xc2e   :  { %v1128_v40 = vsub.f32 1.0, %v2644_v25  ;;  %v1135_v43 = vmul.f32 %v2644_v25, %v1034_v54 }
 0xc86   :  { %v1119_v26 = vpop.permute.xlu0 %1118 }
 0xc87   :  { %v1121_v27 = vmul.f32 %v2644_v25, %v1119_v26 }
 0xc89   :  { %1123 = vrot.lane.b32.xlu1 %v1121_v27, %s2807_s2 }
 0xcf0   :  { %v1005_v28 = vpop.f32.mrb[8].mxu1 }
 0xcf1   :  { %v2303_v15 = vpop.f32.mrb[9].mxu1  ;;  %v1006_v35 = vadd.f32 %v2990_v3, %v1005_v28 }
 0xcf3   :  { %v2036_v36 = vmul.f32 -1.442695, %v1006_v35 }
 0xcfb   :  { %v1124_v29 = vpop.permute.xlu1 %1123 }
 0xcfc   :  { %v1126_v30 = vadd.f32 %v1124_v29, %v1110_v8 }
 0xcfe   :  { %2645 = vtanh.f32 %v1126_v30 }
 0xcff   :  { %2647 = vpow2.f32 %v2036_v36 }
 0xd08   :  { %v2646_v31 = vpop.eup %2645 }
 0xd09   :  { %1130 = vrot.lane.b32.xlu0 %v2646_v31, %s2808_s30  ;;  %v2648_v38 = vpop.eup %2647 }
 0xd0a   :  { %v1012_v39 = vadd.f32 1.0, %v2648_v38 }
 0xd0c   :  { %2649 = vrcp.f32 %v1012_v39 }
 0xd0d   :  { %1016 = vrot.lane.b32.xlu0 %v1006_v35, %s2806_s0 }
 0xd16   :  { %v2650_v48 = vpop.eup %2649 }
 0xd17   :  { %v1026_v54 = vsub.f32 1.0, %v2650_v48  ;;  %v1032_v56 = vmul.f32 %v2650_v48, %v3097_v17 }
 0xd7b   :  { %v1131_v42 = vpop.permute.xlu0 %1130 }
 0xd7c   :  { %v1133_v44 = vmul.f32 %v1131_v42, %v1128_v40 }
 0xd7e   :  { %v3114_v45 = vadd.f32 %v1135_v43, %v1133_v44 }
 0xd7f   :  { %v1017_v47 = vpop.permute.xlu0 %1016 }
 0xd80   :  { %1138 = vrot.lane.b32.xlu1 %v3114_v45, %s2808_s30  ;;  %v1019_v49 = vmul.f32 %v2650_v48, %v1017_v47  ;;  %v1340_v28 = vrot.slane %v3114_v45, 6 }
 0xd84   :  { %1021 = vrot.lane.b32.xlu1 %v1019_v49, %s2807_s2 }
 0xdf2   :  { %v1139_v50 = vpop.permute.xlu1 %1138 }
 0xdf3   :  { %2343 = vmatmul.mubr.msk.f32.vlgmr.msra.gmra.mrb[10].mxu1 %vm182_vm3, %v1139_v50 }
 0xdf4   :  { %2533 = vmatpush3.bf16.msra.mxu1 %v2949_v32  ;;  %2361 = vmatprep.mubr.msk.f32.mxu1 %vm2804_vm0, %v2805_v1 }
 0xdf5   :  { %2534 = vmatprep.subr.bf16.mxu1 %v2803_v0 }
 0xdf6   :  { %v1022_v51 = vpop.permute.xlu1 %1021 }
 0xdf7   :  { %v1024_v52 = vadd.f32 %v1022_v51, %v1006_v35 }
 0xdf8   :  { %2536 = vmatpush3.bf16.msra.mxu1 %v2952_v34 }
 0xdf9   :  { %2651 = vtanh.f32 %v1024_v52  ;;  %2537 = vmatprep.subr.bf16.mxu1 %v2803_v0 }
 0xdfc   :  { %2539 = vmatpush3.bf16.msra.mxu1 %v2956_v37 }
 0xdfd   :  { %2540 = vmatprep.subr.bf16.mxu1 %v2803_v0 }
 0xe00   :  { %2542 = vmatpush3.bf16.msra.mxu1 %v2961_v41 }
 0xe01   :  { %2561 = vmatprep.subr.bf16.mxu1 %v2803_v0 }
 0xe03   :  { %v2652_v53 = vpop.eup %2651 }
 0xe04   :  { %1028 = vrot.lane.b32.xlu0 %v2652_v53, %s2808_s30 }
 0xe76   :  { %v1029_v55 = vpop.permute.xlu0 %1028 }
 0xe77   :  { %v1031_v57 = vmul.f32 %v1029_v55, %v1026_v54 }
 0xe79   :  { %v3132_v58 = vadd.f32 %v1032_v56, %v1031_v57 }
 0xe7b   :  { %v1141_v60 = vsel %vm182_vm3, %v1139_v50, %v3132_v58 }
 0xe7c   :  { %2332 = vmatmul.mubr.msk.f32.vlgmr.msra.gmra.mrb[10].mxu0 %vm296_vm4, %v1141_v60 }
 0xe7d   :  { %2545 = vmatpush3.bf16.msra.mxu0 %v2907_v5  ;;  %2372 = vmatprep.mubr.msk.f32.mxu0 %vm2804_vm0, %v2805_v1 }
 0xe7e   :  { %2546 = vmatprep.subr.bf16.mxu0 %v2803_v0 }
 0xe81   :  { %2548 = vmatpush3.bf16.msra.mxu0 %v2924_v10 }
 0xe82   :  { %2549 = vmatprep.subr.bf16.mxu0 %v2803_v0 }
 0xec6   :  { %v1308_v61 = vpop.f32.mrb[10].mxu1 }
 0xec7   :  { %v1313_v59 = vrot.slane %v1308_v61, 6  ;;  %v2344_v62 = vpop.f32.mrb[11].mxu1 }
 0xec9   :  { %v1315_v63 = vadd.f32 %v1313_v59, %v2939_v13 }
 0xecb   :  { %v1316_v2 = vadd.f32 %v2943_v16, %v1315_v63 }
 0xecd   :  { %1324 = vrot.lane.b32.xlu1 %v1316_v2, %s2806_s0  ;;  %v2042_v4 = vmul.f32 -1.442695, %v1316_v2 }
 0xecf   :  { %2653 = vpow2.f32 %v2042_v4 }
 0xed9   :  { %v2654_v6 = vpop.eup %2653 }
 0xeda   :  { %v1320_v7 = vadd.f32 1.0, %v2654_v6 }
 0xedc   :  { %2655 = vrcp.f32 %v1320_v7 }
 0xee6   :  { %v2656_v8 = vpop.eup %2655 }
 0xee7   :  { %v1334_v15 = vsub.f32 1.0, %v2656_v8  ;;  %v1342_v30 = vmul.f32 %v2656_v8, %v1340_v28 }
 0xf3f   :  { %v1325_v9 = vpop.permute.xlu1 %1324 }
 0xf40   :  { %v1327_v11 = vmul.f32 %v2656_v8, %v1325_v9 }
 0xf42   :  { %1329 = vrot.lane.b32.xlu0 %v1327_v11, %s2807_s2 }
 0xf4f   :  { %v1211_v12 = vpop.f32.mrb[10].mxu0 }
 0xf50   :  { %v1212_v14 = vadd.f32 %v2990_v3, %v1211_v12  ;;  %v2333_v18 = vpop.f32.mrb[11].mxu0 }
 0xf52   :  { %1222 = vrot.lane.b32.xlu0 %v1212_v14, %s2806_s0  ;;  %v2040_v19 = vmul.f32 -1.442695, %v1212_v14 }
 0xf54   :  { %2657 = vpow2.f32 %v2040_v19 }
 0xf5e   :  { %v2658_v20 = vpop.eup %2657 }
 0xf5f   :  { %v1218_v23 = vadd.f32 1.0, %v2658_v20 }
 0xfb4   :  { %v1330_v21 = vpop.permute.xlu0 %1329 }
 0xfb5   :  { %v1332_v22 = vadd.f32 %v1330_v21, %v1316_v2 }
 0xfb7   :  { %2659 = vtanh.f32 %v1332_v22 }
 0xfb8   :  { %2661 = vrcp.f32 %v1218_v23 }
 0xfc1   :  { %v2660_v24 = vpop.eup %2659 }
 0xfc2   :  { %1336 = vrot.lane.b32.xlu1 %v2660_v24, %s2808_s30  ;;  %v2662_v25 = vpop.eup %2661 }
 0xfc3   :  { %v1232_v43 = vsub.f32 1.0, %v2662_v25  ;;  %v1238_v45 = vmul.f32 %v2662_v25, %v3132_v58 }
 0xfc4   :  { %v1223_v26 = vpop.permute.xlu0 %1222 }
 0xfc5   :  { %v1225_v27 = vmul.f32 %v2662_v25, %v1223_v26 }
 0xfc7   :  { %1227 = vrot.lane.b32.xlu0 %v1225_v27, %s2807_s2 }
0x1034   :  { %v1337_v29 = vpop.permute.xlu1 %1336 }
0x1035   :  { %v1339_v31 = vmul.f32 %v1337_v29, %v1334_v15 }
0x1037   :  { %v3152_v35 = vadd.f32 %v1342_v30, %v1339_v31 }
0x1039   :  { %1345 = vrot.lane.b32.xlu0 %v3152_v35, %s2808_s30  ;;  %v1228_v36 = vpop.permute.xlu0 %1227  ;;  %v1451_v38 = vrot.slane %v3152_v35, 2  ;;  %v1554_v24 = vrot.slane %v3152_v35, 6 }
0x103a   :  { %v1230_v39 = vadd.f32 %v1228_v36, %v1212_v14 }
0x103b   :  { %1452 = vrot.lane.b32.xlu1 %v1451_v38, %s2808_s30 }
0x103c   :  { %2663 = vtanh.f32 %v1230_v39 }
0x1046   :  { %v2664_v40 = vpop.eup %2663 }
0x1047   :  { %1234 = vrot.lane.b32.xlu1 %v2664_v40, %s2808_s30 }
0x10ab   :  { %v1346_v50 = vpop.permute.xlu0 %1345 }
0x10ad   :  { %v1453_v42 = vpop.permute.xlu1 %1452 }
0x10ae   :  { %2373 = vmatmul.mubr.msk.f32.vlgmr.msra.gmra.mrb[12].mxu0 %vm182_vm3, %v1453_v42 }
0x10af   :  { %2551 = vmatpush3.bf16.msra.mxu0 %v2949_v32  ;;  %2391 = vmatprep.mubr.msk.f32.mxu0 %vm2804_vm0, %v2805_v1 }
0x10b0   :  { %2552 = vmatprep.subr.bf16.mxu0 %v2803_v0 }
0x10b3   :  { %2554 = vmatpush3.bf16.msra.mxu0 %v2952_v34 }
0x10b4   :  { %2555 = vmatprep.subr.bf16.mxu0 %v2803_v0 }
0x10b7   :  { %2557 = vmatpush3.bf16.msra.mxu0 %v2956_v37 }
0x10b8   :  { %2558 = vmatprep.subr.bf16.mxu0 %v2803_v0 }
0x10b9   :  { %v1235_v44 = vpop.permute.xlu1 %1234 }
0x10ba   :  { %v1237_v47 = vmul.f32 %v1235_v44, %v1232_v43 }
0x10bb   :  { %2560 = vmatpush3.bf16.msra.mxu0 %v2961_v41 }
0x10bc   :  { %v3170_v48 = vadd.f32 %v1238_v45, %v1237_v47 }
0x10be   :  { %v1349_v49 = vrot.slane %v3170_v48, 6 }
0x10c0   :  { %v1351_v51 = vsel %vm182_vm3, %v1346_v50, %v1349_v49 }
0x10c1   :  { %v1353_v52 = vrot.slane %v1351_v51, 2 }
0x10c3   :  { %2362 = vmatmul.mubr.msk.f32.vlgmr.msra.gmra.mrb[12].mxu1 %vm296_vm4, %v1353_v52 }
0x10c4   :  { %2563 = vmatpush3.bf16.msra.mxu1 %v2907_v5  ;;  %2402 = vmatprep.mubr.msk.f32.mxu1 %vm2804_vm0, %v2805_v1 }
0x10c5   :  { %2564 = vmatprep.subr.bf16.mxu1 %v2803_v0 }
0x10c8   :  { %2566 = vmatpush3.bf16.msra.mxu1 %v2924_v10 }
0x10c9   :  { %2567 = vmatprep.subr.bf16.mxu1 %v2803_v0 }
0x1181   :  { %v1522_v53 = vpop.f32.mrb[12].mxu0 }
0x1182   :  { %v1527_v54 = vrot.slane %v1522_v53, 4  ;;  %v2374_v55 = vpop.f32.mrb[13].mxu0 }
0x1184   :  { %v1529_v56 = vadd.f32 %v1527_v54, %v2939_v13 }
0x1186   :  { %v1530_v57 = vadd.f32 %v2943_v16, %v1529_v56 }
0x1188   :  { %1538 = vrot.lane.b32.xlu1 %v1530_v57, %s2806_s0  ;;  %v2046_v59 = vmul.f32 -1.442695, %v1530_v57 }
0x118a   :  { %2665 = vpow2.f32 %v2046_v59 }
0x1194   :  { %v2666_v10 = vpop.eup %2665 }
0x1195   :  { %v1534_v62 = vadd.f32 1.0, %v2666_v10 }
0x1196   :  { %v1422_v60 = vpop.f32.mrb[12].mxu1 }
0x1197   :  { %v1423_v5 = vadd.f32 %v2990_v3, %v1422_v60  ;;  %v2363_v61 = vpop.f32.mrb[13].mxu1  ;;  %2667 = vrcp.f32 %v1534_v62 }
0x1199   :  { %1433 = vrot.lane.b32.xlu1 %v1423_v5, %s2806_s0  ;;  %v2044_v63 = vmul.f32 -1.442695, %v1423_v5 }
0x119b   :  { %2669 = vpow2.f32 %v2044_v63 }
0x11a1   :  { %v2668_v2 = vpop.eup %2667 }
0x11a2   :  { %v1548_v23 = vsub.f32 1.0, %v2668_v2  ;;  %v1556_v26 = vmul.f32 %v2668_v2, %v1554_v24 }
0x11a5   :  { %v2670_v4 = vpop.eup %2669 }
0x11a6   :  { %v1429_v8 = vadd.f32 1.0, %v2670_v4 }
0x11a8   :  { %2671 = vrcp.f32 %v1429_v8 }
0x11b2   :  { %v2672_v9 = vpop.eup %2671 }
0x11b3   :  { %v1443_v30 = vsub.f32 1.0, %v2672_v9  ;;  %v1449_v36 = vmul.f32 %v2672_v9, %v3170_v48 }
0x11fa   :  { %v1539_v6 = vpop.permute.xlu1 %1538 }
0x11fb   :  { %v1541_v7 = vmul.f32 %v2668_v2, %v1539_v6 }
0x11fd   :  { %1543 = vrot.lane.b32.xlu0 %v1541_v7, %s2807_s2 }
0x120b   :  { %v1434_v11 = vpop.permute.xlu1 %1433 }
0x120c   :  { %v1436_v12 = vmul.f32 %v2672_v9, %v1434_v11 }
0x120e   :  { %1438 = vrot.lane.b32.xlu1 %v1436_v12, %s2807_s2 }
0x126f   :  { %v1544_v14 = vpop.permute.xlu0 %1543 }
0x1270   :  { %v1546_v18 = vadd.f32 %v1544_v14, %v1530_v57 }
0x1272   :  { %2673 = vtanh.f32 %v1546_v18 }
0x127c   :  { %v2674_v19 = vpop.eup %2673 }
0x127d   :  { %1550 = vrot.lane.b32.xlu0 %v2674_v19, %s2808_s30 }
0x1280   :  { %v1439_v20 = vpop.permute.xlu1 %1438 }
0x1281   :  { %v1441_v21 = vadd.f32 %v1439_v20, %v1423_v5 }
0x1283   :  { %2675 = vtanh.f32 %v1441_v21 }
0x128d   :  { %v2676_v22 = vpop.eup %2675 }
0x128e   :  { %1445 = vrot.lane.b32.xlu1 %v2676_v22, %s2808_s30 }
0x12ef   :  { %v1551_v25 = vpop.permute.xlu0 %1550 }
0x12f0   :  { %v1553_v27 = vmul.f32 %v1551_v25, %v1548_v23 }
0x12f2   :  { %v3191_v28 = vadd.f32 %v1556_v26, %v1553_v27 }
0x12f4   :  { %v1665_v15 = vrot.slane %v3191_v28, 4  ;;  %v1768_v2 = vrot.slane %v3191_v28, 6 }
0x12f6   :  { %1666 = vrot.lane.b32.xlu0 %v1665_v15, %s2808_s30 }
0x12fa   :  { %1559 = vrot.lane.b32.xlu0 %v3191_v28, %s2808_s30 }
0x1300   :  { %v1446_v29 = vpop.permute.xlu1 %1445 }
0x1301   :  { %v1448_v31 = vmul.f32 %v1446_v29, %v1443_v30  ;;  %v1879_v29 = vrot.slane %v3056_v33, 6 }
0x1303   :  { %v3198_v38 = vadd.f32 %v1449_v36, %v1448_v31  ;;  %v1881_v31 = vrot.slane %v3097_v17, 4 }
0x1305   :  { %v1563_v39 = vrot.slane %v3198_v38, 4 }
0x1368   :  { %v1667_v35 = vpop.permute.xlu0 %1666 }
0x1369   :  { %2403 = vmatmul.mubr.msk.f32.vlgmr.msra.gmra.mrb[14].mxu1 %vm182_vm3, %v1667_v35  ;;  %v1884_v35 = vrot.slane %v3132_v58, 2  ;;  %v1903_v58 = vld [vmem:[#allocation7 + $0x8] sm:$0xff] }
0x136a   :  { %2569 = vmatpush3.bf16.msra.mxu1 %v2949_v32  ;;  %2421 = vmatprep.mubr.msk.f32.mxu1 %vm2804_vm0, %v2805_v1 }
0x136b   :  { %2570 = vmatprep.subr.bf16.mxu1 %v2803_v0 }
0x136c   :  { %v1560_v40 = vpop.permute.xlu0 %1559 }
0x136d   :  { %v1565_v42 = vsel %vm182_vm3, %v1560_v40, %v1563_v39 }
0x136e   :  { %v1567_v43 = vrot.slane %v1565_v42, 4  ;;  %2572 = vmatpush3.bf16.msra.mxu1 %v2952_v34 }
0x136f   :  { %2573 = vmatprep.subr.bf16.mxu1 %v2803_v0 }
0x1370   :  { %2392 = vmatmul.mubr.msk.f32.vlgmr.msra.gmra.mrb[14].mxu0 %vm296_vm4, %v1567_v43  ;;  %v1902_v43 = vld [vmem:[#allocation7] sm:$0xff] }
0x1372   :  { %2575 = vmatpush3.bf16.msra.mxu1 %v2956_v37 }
0x1373   :  { %2576 = vmatprep.subr.bf16.mxu1 %v2803_v0 }
0x1376   :  { %2578 = vmatpush3.bf16.msra.mxu1 %v2961_v41 }
0x143c   :  { %v1736_v1 = vpop.f32.mrb[14].mxu1 }
0x143d   :  { %v1741_v32 = vrot.slane %v1736_v1, 2  ;;  %v2404_v44 = vpop.f32.mrb[15].mxu1  ;;  %v1904_v1 = vld [vmem:[#allocation7 + $0x10] sm:$0xff] }
0x143e   :  { %v1905_v44 = vld [vmem:[#allocation7 + $0x18] sm:$0xff] }
0x143f   :  { %v1743_v45 = vadd.f32 %v1741_v32, %v2939_v13  ;;  %v2579_v32 = vpack.c.bf16 %v1903_v58, %v1902_v43 }
0x1441   :  { %v1744_v47 = vadd.f32 %v2943_v16, %v1743_v45  ;;  %v2583_v45 = vpack.c.bf16 %v1905_v44, %v1904_v1  ;;  %2580 = vmatprep.subr.bf16.mxu0 %v2579_v32 }
0x1442   :  { %2582 = vmatpush3.bf16.msra.mxu0 %v2579_v32 }
0x1443   :  { %1752 = vrot.lane.b32.xlu1 %v1744_v47, %s2806_s0  ;;  %v1636_v34 = vpop.f32.mrb[14].mxu0  ;;  %v2050_v37 = vmul.f32 -1.442695, %v1744_v47  ;;  %2584 = vmatprep.subr.bf16.mxu0 %v2583_v45 }
0x1444   :  { %v1637_v49 = vadd.f32 %v2990_v3, %v1636_v34  ;;  %v2393_v50 = vpop.f32.mrb[15].mxu0 }
0x1445   :  { %2677 = vpow2.f32 %v2050_v37 }
0x1446   :  { %1647 = vrot.lane.b32.xlu0 %v1637_v49, %s2806_s0  ;;  %v2048_v51 = vmul.f32 -1.442695, %v1637_v49  ;;  %2586 = vmatpush3.bf16.msra.mxu0 %v2583_v45 }
0x1448   :  { %2679 = vpow2.f32 %v2048_v51 }
0x144f   :  { %v2678_v0 = vpop.eup %2677 }
0x1450   :  { %v1748_v52 = vadd.f32 1.0, %v2678_v0 }
0x1452   :  { %v2680_v41 = vpop.eup %2679  ;;  %2681 = vrcp.f32 %v1748_v52 }
0x1453   :  { %v1643_v53 = vadd.f32 1.0, %v2680_v41 }
0x1455   :  { %2683 = vrcp.f32 %v1643_v53 }
0x145c   :  { %v2682_v13 = vpop.eup %2681 }
0x145d   :  { %v1762_v63 = vsub.f32 1.0, %v2682_v13  ;;  %v1770_v6 = vmul.f32 %v2682_v13, %v1768_v2 }
0x145f   :  { %v2684_v55 = vpop.eup %2683 }
0x1460   :  { %v1657_v11 = vsub.f32 1.0, %v2684_v55  ;;  %v1663_v14 = vmul.f32 %v2684_v55, %v3198_v38 }
0x14b5   :  { %v1753_v16 = vpop.permute.xlu1 %1752 }
0x14b6   :  { %v1755_v54 = vmul.f32 %v2682_v13, %v1753_v16 }
0x14b8   :  { %1757 = vrot.lane.b32.xlu1 %v1755_v54, %s2807_s2  ;;  %v1648_v56 = vpop.permute.xlu0 %1647  ;;  %v2053_v54 = vld [vmem:[#allocation6 + $0x3] ss:$0 sm:$0xff] }
0x14b9   :  { %v1650_v57 = vmul.f32 %v2684_v55, %v1648_v56 }
0x14bb   :  { %1652 = vrot.lane.b32.xlu0 %v1650_v57, %s2807_s2 }
0x152a   :  { %v1758_v60 = vpop.permute.xlu1 %1757 }
0x152b   :  { %v1760_v5 = vadd.f32 %v1758_v60, %v1744_v47 }
0x152d   :  { %2685 = vtanh.f32 %v1760_v5  ;;  %v1653_v61 = vpop.permute.xlu0 %1652 }
0x152e   :  { %v1655_v59 = vadd.f32 %v1653_v61, %v1637_v49  ;;  %v1886_v49 = vrot.slane %v3198_v38, 6 }
0x1530   :  { %2687 = vtanh.f32 %v1655_v59  ;;  %v1898_v52 = vsel %vm1893_vm5, %v3170_v48, %v1886_v49 }
0x1537   :  { %v2686_v10 = vpop.eup %2685 }
0x1538   :  { %1764 = vrot.lane.b32.xlu1 %v2686_v10, %s2808_s30 }
0x153a   :  { %v2688_v62 = vpop.eup %2687 }
0x153b   :  { %1659 = vrot.lane.b32.xlu0 %v2688_v62, %s2808_s30 }
0x15aa   :  { %v1765_v4 = vpop.permute.xlu1 %1764 }
0x15ab   :  { %v1767_v7 = vmul.f32 %v1765_v4, %v1762_v63 }
0x15ad   :  { %v1771_v8 = vadd.f32 %v1770_v6, %v1767_v7  ;;  %v1660_v9 = vpop.permute.xlu0 %1659 }
0x15ae   :  { %v1662_v12 = vmul.f32 %v1660_v9, %v1657_v11 }
0x15af   :  { %1773 = vrot.lane.b32.xlu1 %v1771_v8, %s2808_s30 }
0x15b0   :  { %v1664_v18 = vadd.f32 %v1663_v14, %v1662_v12 }
0x15b2   :  { %v1777_v19 = vrot.slane %v1664_v18, 2  ;;  %v1888_v51 = vrot.slane %v1664_v18, 4 }
0x15b4   :  { %v1899_v53 = vsel %vm89_vm1, %v1898_v52, %v1888_v51 }
0x1621   :  { %v1774_v20 = vpop.permute.xlu1 %1773 }
0x1622   :  { %v1779_v21 = vsel %vm182_vm3, %v1774_v20, %v1777_v19 }
0x1623   :  { %v1781_v22 = vrot.slane %v1779_v21, 6 }
0x1625   :  { %2422 = vmatmul.mubr.msk.f32.vlgmr.msra.gmra.mrb[16].mxu1 %vm296_vm4, %v1781_v22 }
0x16f8   :  { %v1850_v23 = vpop.f32.mrb[16].mxu1 }
0x16f9   :  { %v1851_v24 = vadd.f32 %v2990_v3, %v1850_v23  ;;  %v2423_v25 = vpop.f32.mrb[17].mxu1  ;;  %v1894_v3 = vsel %vm1893_vm5, %v3018_v46, %v1879_v29 }
0x16fa   :  { %v1895_v39 = vsel %vm89_vm1, %v1894_v3, %v1881_v31 }
0x16fb   :  { %1861 = vrot.lane.b32.xlu0 %v1851_v24, %s2806_s0  ;;  %v2052_v26 = vmul.f32 -1.442695, %v1851_v24  ;;  %v1897_v40 = vsel %vm1896_vm6, %v1895_v39, %v1884_v35 }
0x16fd   :  { %2689 = vpow2.f32 %v2052_v26 }
0x1707   :  { %v2690_v27 = vpop.eup %2689 }
0x1708   :  { %v1857_v28 = vadd.f32 1.0, %v2690_v27 }
0x170a   :  { %2691 = vrcp.f32 %v1857_v28 }
0x1714   :  { %v2692_v15 = vpop.eup %2691 }
0x1715   :  { %v1871_v47 = vsub.f32 1.0, %v2692_v15  ;;  %v1877_v50 = vmul.f32 %v2692_v15, %v1664_v18 }
0x176d   :  { %v1862_v30 = vpop.permute.xlu0 %1861 }
0x176e   :  { %v1864_v36 = vmul.f32 %v2692_v15, %v1862_v30 }
0x1770   :  { %1866 = vrot.lane.b32.xlu1 %v1864_v36, %s2807_s2 }
0x1774   :  { %1912 = vrot.lane.b32.xlu1 %v1897_v40, %s2808_s30 }
0x17e2   :  { %v1867_v33 = vpop.permute.xlu1 %1866 }
0x17e3   :  { %v1869_v42 = vadd.f32 %v1867_v33, %v1851_v24 }
0x17e5   :  { %2693 = vtanh.f32 %v1869_v42 }
0x17e6   :  { %v1913_v17 = vpop.permute.xlu1 %1912 }
0x17e7   :  { %2432 = vmatprep.mubr.msk.f32.mxu0 %vm182_vm3, %v1913_v17 }
0x17ef   :  { %v2694_v46 = vpop.eup %2693 }
0x17f0   :  { %1873 = vrot.lane.b32.xlu0 %v2694_v46, %s2808_s30 }
0x1862   :  { %v1874_v34 = vpop.permute.xlu0 %1873 }
0x1863   :  { %v1876_v37 = vmul.f32 %v1874_v34, %v1871_v47 }
0x1865   :  { %v1878_v0 = vadd.f32 %v1877_v50, %v1876_v37 }
0x1867   :  { %v1891_v41 = vrot.slane %v1878_v0, 2 }
0x1869   :  { %v1900_v13 = vsel %vm1896_vm6, %v1899_v53, %v1891_v41 }
0x186a   :  { %1914 = vrot.lane.b32.xlu0 %v1900_v13, %s2808_s30 }
0x18dc   :  { %v1915_v16 = vpop.permute.xlu0 %1914 }
0x18dd   :  { %2433 = vmatmul.mubr.msk.f32.vlgmr.msra.gmra.mrb[16].mxu0 %vm182_vm3, %v1915_v16 }
0x19b0   :  { %v2434_v55 = vpop.f32.mrb[16].mxu0 }
0x19b1   :  { %v1992_v38 = vadd.f32 %v2434_v55, %v2053_v54  ;;  %v1986_v56 = vpop.f32.mrb[17].mxu0 }
0x19b2   :  { %v1987_v57 = vadd.f32 %v2053_v54, %v1986_v56 }
0x19b3   :  { %v2057_v60 = vmul.f32 -1.442695, %v1992_v38 }
0x19b4   :  { %v2056_v5 = vmul.f32 -1.442695, %v1987_v57 }
0x19b5   :  { %2695 = vpow2.f32 %v2057_v60 }
0x19b6   :  { %2697 = vpow2.f32 %v2056_v5 }
0x19bf   :  { %v2696_v61 = vpop.eup %2695 }
0x19c0   :  { %v2698_v48 = vpop.eup %2697  ;;  %v2002_v59 = vadd.f32 1.0, %v2696_v61 }
0x19c1   :  { %v2001_v10 = vadd.f32 1.0, %v2698_v48 }
0x19c2   :  { %2699 = vrcp.f32 %v2002_v59 }
0x19c3   :  { %2701 = vrcp.f32 %v2001_v10 }
0x19cc   :  { %v2700_v62 = vpop.eup %2699 }
0x19cd   :  { %v2702_v63 = vpop.eup %2701  ;;  %2008 = vst.msk [vmem:[%s3261_s6 + $0x8] sm:$0xff] %vm182_vm3, %v2700_v62 }
0x19ce   :  { %2007 = vst.msk [vmem:[%s3261_s6] sm:$0xff] %vm182_vm3, %v2702_v63 }
0x19cf   :  { %2013 = vsyncpa [#allocation3], 1 }
0x19d0   :  { %2014 = vsyncpa [#allocation5], 1 }
0x19d1   :  { %2015 = vsyncpa [#allocation8], 1 }

</bundles_post_ra>
